<compile_context>
chip_gen: v6e
topology: v6e:2x2x1
jax: 0.10.0
libtpu: 0.0.40
codegen_flags: <defaults>
</compile_context>

<pallas_src>
import functools
from typing import NamedTuple, Tuple

import numpy as np

import jax
import jax.numpy as jnp
from jax import lax
from jax.experimental import pallas as pl
from jax.experimental.pallas import tpu as pltpu


# ----------------------------------------------------------------------------
# Static configuration (per-sample geometry; batch lives on the grid)
# ----------------------------------------------------------------------------
class _Cfg(NamedTuple):
    N: int
    Cin: int
    C1: int
    C2: int
    K: int
    Cg: int        # sublane group size per conv2 tap (8-aligned)
    Hp1: int       # conv1 zero-padded grid side (imsize + 2)
    G1: int        # Hp1*Hp1  (flattened per-sample conv1 grid)
    span1: int     # conv1 output lane span (G1 + Hp1 + 1, covers pool shifts)
    LS1: int       # conv1 im2col slab lanes (span1 rounded to 128)
    in_len: int    # padded flattened-input length needed by the slab build
    P1: int        # pool1 output side
    Hp2: int       # conv2 zero-padded grid side (P1 + 2)
    G2: int
    span2: int
    LT2: int       # conv2 activation / slab lanes (rounded to 128)
    P2: int
    n_s: int       # P2*P2 pooled pixels per channel feeding fc1
    F1: int
    F2: int
    out_chan: int
    tap_off1: Tuple[int, ...]
    fc_src: Tuple[int, ...]


def _round_up(v, m):
    return ((v + m - 1) // m) * m


def _make_cfg(in_chan, out_chan, imsize, batch, kernel_size=5):
    K = kernel_size
    Hp1 = imsize + 2                      # padding = 1
    Ho1 = Hp1 - K + 1
    P1 = Ho1 // 2
    G1 = Hp1 * Hp1
    span1 = G1 + Hp1 + 1
    LS1 = _round_up(span1, 128)
    in_len = (K - 1) * Hp1 + (K - 1) + span1
    Hp2 = P1 + 2
    Ho2 = Hp2 - K + 1
    P2 = Ho2 // 2
    G2 = Hp2 * Hp2
    span2 = G2 + Hp2 + 1
    LT2 = _round_up((K - 1) * Hp2 + (K - 1) + span2, 128)
    tap_off1 = tuple(kh * Hp1 + kw for kh in range(K) for kw in range(K))
    fc_src = tuple(2 * ph * Hp2 + 2 * pw for ph in range(P2) for pw in range(P2))
    return _Cfg(N=batch, Cin=in_chan, C1=6, C2=16, K=K, Cg=8,
                Hp1=Hp1, G1=G1, span1=span1, LS1=LS1, in_len=in_len, P1=P1,
                Hp2=Hp2, G2=G2, span2=span2, LT2=LT2, P2=P2, n_s=P2 * P2,
                F1=120, F2=84, out_chan=out_chan,
                tap_off1=tap_off1, fc_src=fc_src)


# ----------------------------------------------------------------------------
# Batch-independent selection ("gather as matmul") matrix, built on the host
# ----------------------------------------------------------------------------
def _pool1_regrid_matrix(cfg):
    """(G1, LT2): pick the 2x2-window top-left lanes of the per-sample conv1
    grid and scatter them into the interior of conv2's zero-padded grid."""
    S = np.zeros((cfg.G1, cfg.LT2), np.float32)
    for ph in range(cfg.P1):
        for pw in range(cfg.P1):
            src = (2 * ph) * cfg.Hp1 + 2 * pw
            dst = (ph + 1) * cfg.Hp2 + (pw + 1)
            S[src, dst] = 1.0
    return S


# ----------------------------------------------------------------------------
# Parameter construction (PyTorch-default-style uniform init)
# ----------------------------------------------------------------------------
def _uniform(key, shape, fan_in):
    bound = 1.0 / float(np.sqrt(fan_in))
    return jax.random.uniform(key, shape, jnp.float32, -bound, bound)


def init_params(key, in_chan, out_chan, imsize, kernel_size=5):
    z = 0.5 * (imsize - 2)
    z = int(0.5 * (z - 2))
    flat = 16 * z * z
    k2 = kernel_size * kernel_size
    ks = jax.random.split(key, 12)
    p = {}
    p["conv1_w"] = _uniform(ks[0], (6, in_chan, kernel_size, kernel_size), in_chan * k2)
    p["conv1_b"] = _uniform(ks[1], (6,), in_chan * k2)
    p["conv2_w"] = _uniform(ks[2], (16, 6, kernel_size, kernel_size), 6 * k2)
    p["conv2_b"] = _uniform(ks[3], (16,), 6 * k2)
    p["fc1_w"] = _uniform(ks[4], (120, flat), flat)
    p["fc1_b"] = _uniform(ks[5], (120,), flat)
    p["fc2_w"] = _uniform(ks[6], (84, 120), 120)
    p["fc2_b"] = _uniform(ks[7], (84,), 120)
    p["fc3_w"] = _uniform(ks[8], (out_chan, 84), 84)
    p["fc3_b"] = _uniform(ks[9], (out_chan,), 84)
    p["fc4_w"] = _uniform(ks[10], (out_chan, 84), 84)
    p["fc4_b"] = _uniform(ks[11], (out_chan,), 84)
    return p


def prepare_fused_params(params, in_chan, out_chan, imsize, batch, kernel_size=5):
    """One-time weight re-layout + selection-matrix construction."""
    cfg = _make_cfg(in_chan, out_chan, imsize, batch, kernel_size)
    K = cfg.K
    assert params["fc1_w"].shape[1] == cfg.C2 * cfg.n_s

    # conv1 weight -> (C1, K*K*Cin), row order (kh, kw, cin) matching the slab
    w1 = jnp.transpose(params["conv1_w"], (0, 2, 3, 1)).reshape(cfg.C1, K * K * cfg.Cin)
    # conv2 weight -> (C2, K*K*Cg): per-tap 8-row groups, channels in rows 0..C1-1
    w2 = jnp.transpose(params["conv2_w"], (0, 2, 3, 1)).reshape(cfg.C2, K * K, cfg.C1)
    w2 = jnp.pad(w2, ((0, 0), (0, 0), (0, cfg.Cg - cfg.C1))).reshape(cfg.C2, K * K * cfg.Cg)
    # fc1 weight reordered to the (s*C2 + c) sublane stacking of pooled pixels
    wf1 = jnp.transpose(params["fc1_w"].reshape(cfg.F1, cfg.C2, cfg.n_s), (0, 2, 1))
    wf1 = wf1.reshape(cfg.F1, cfg.n_s * cfg.C2)
    # fc3 || fc4 merged
    wf34 = jnp.concatenate([params["fc3_w"], params["fc4_w"]], axis=0)
    bf34 = jnp.concatenate([params["fc3_b"], params["fc4_b"]], axis=0)

    consts = {
        "w1": w1, "b1": params["conv1_b"].reshape(cfg.C1, 1),
        "s1": jnp.asarray(_pool1_regrid_matrix(cfg), jnp.bfloat16),  # 0/1 exact
        "w2": w2, "b2": params["conv2_b"].reshape(cfg.C2, 1),
        "wf1": wf1, "bf1": params["fc1_b"].reshape(cfg.F1, 1),
        "wf2": params["fc2_w"], "bf2": params["fc2_b"].reshape(cfg.F2, 1),
        "wf34": wf34, "bf34": bf34.reshape(2 * cfg.out_chan, 1),
    }
    return consts, cfg


# ----------------------------------------------------------------------------
# The fused Pallas kernel: one grid step == one sample, all layers in VMEM
# ----------------------------------------------------------------------------
def _lenet_fused_kernel(slab1_ref, w1_ref, b1_ref, s1_ref, w2_ref, b2_ref,
                        wf1_ref, bf1_ref, wf2_ref, bf2_ref, wf34_ref, bf34_ref,
                        o_ref, slab2_ref, *, cfg):
    f32 = jnp.float32

    # ---- conv1 (+bias, ReLU): ONE deep-contraction matmul over the im2col slab
    z1 = jnp.dot(w1_ref[...], slab1_ref[0], preferred_element_type=f32)   # (C1, LS1)
    z1 = jnp.maximum(z1 + b1_ref[...], 0.0)

    # ---- fused 2x2 max-pool: max of 4 lane shifts on the Hp1 x Hp1 grid ----
    g1, r1 = cfg.G1, cfg.Hp1
    m1 = jnp.maximum(
        jnp.maximum(z1[:, 0:g1], z1[:, 1:g1 + 1]),
        jnp.maximum(z1[:, r1:g1 + r1], z1[:, r1 + 1:g1 + r1 + 1]))        # (C1, G1)

    # ---- regrid pooled conv1 onto conv2's zero-padded grid (bf16 selection) -
    a2 = jnp.dot(m1.astype(jnp.bfloat16), s1_ref[...],
                 preferred_element_type=f32)                              # (C1, LT2)

    # ---- conv2 im2col slab in VMEM scratch (25 shifted copies), ONE matmul --
    slab2_ref[...] = jnp.zeros(slab2_ref.shape, slab2_ref.dtype)
    for kh in range(cfg.K):
        for kw in range(cfg.K):
            k = kh * cfg.K + kw
            off = kh * cfg.Hp2 + kw
            slab2_ref[k * cfg.Cg:k * cfg.Cg + cfg.C1, 0:cfg.span2] = \
                a2[:, off:off + cfg.span2]
    z2 = jnp.dot(w2_ref[...], slab2_ref[...], preferred_element_type=f32)  # (C2, LT2)
    z2 = jnp.maximum(z2 + b2_ref[...], 0.0)

    # ---- fused 2x2 max-pool on the Hp2 x Hp2 grid ---------------------------
    g2, r2 = cfg.G2, cfg.Hp2
    m2 = jnp.maximum(
        jnp.maximum(z2[:, 0:g2], z2[:, 1:g2 + 1]),
        jnp.maximum(z2[:, r2:g2 + r2], z2[:, r2 + 1:g2 + r2 + 1]))        # (C2, G2)

    # ---- gather the n_s pooled pixels (static lane slices) -> (n_s*C2, 1) ---
    xfc = jnp.concatenate([m2[:, s:s + 1] for s in cfg.fc_src], axis=0)

    # ---- fc1 / fc2 (single matmuls, weights pre-reordered) ------------------
    h = jnp.maximum(jnp.dot(wf1_ref[...], xfc, preferred_element_type=f32)
                    + bf1_ref[...], 0.0)
    h = jnp.maximum(jnp.dot(wf2_ref[...], h, preferred_element_type=f32)
                    + bf2_ref[...], 0.0)

    # dropout: identity (eval mode)
    # TODO(synk): training-mode dropout (random Bernoulli mask) not implemented.

    # ---- fc3 || fc4 (merged) -------------------------------------------------
    res = jnp.dot(wf34_ref[...], h, preferred_element_type=f32) + bf34_ref[...]
    o_ref[...] = jnp.zeros(o_ref.shape, o_ref.dtype)
    o_ref[0:1, 0:2 * cfg.out_chan, 0:1] = res[jnp.newaxis]


# ----------------------------------------------------------------------------
# Wrapper: one pallas_call for the whole network, batch on a parallel grid axis
# ----------------------------------------------------------------------------
def make_lenet_kg_forward(cfg):
    kernel = functools.partial(_lenet_fused_kernel, cfg=cfg)
    out_rows = 8                                  # sublane-padded output rows
    assert 2 * cfg.out_chan <= out_rows

    def _const_spec(shape):
        nd = len(shape)
        return pl.BlockSpec(shape, lambda i, _nd=nd: (0,) * _nd)

    @jax.jit
    def forward(consts, x):
        assert x.shape == (cfg.N, cfg.Cin, cfg.Hp1 - 2, cfg.Hp1 - 2)

        # ---- wrapper-side conv1 im2col (plain XLA ops, fused under jit) -----
        xp = jnp.pad(x, ((0, 0), (0, 0), (1, 1), (1, 1)))
        xf = xp.reshape(cfg.N, cfg.Cin, cfg.G1)
        xf = jnp.pad(xf, ((0, 0), (0, 0), (0, cfg.in_len - cfg.G1)))
        taps = [xf[:, :, o:o + cfg.span1] for o in cfg.tap_off1]
        slab1 = jnp.stack(taps, axis=1).reshape(
            cfg.N, cfg.K * cfg.K * cfg.Cin, cfg.span1)
        slab1 = jnp.pad(slab1, ((0, 0), (0, 0), (0, cfg.LS1 - cfg.span1)))

        operands = (slab1, consts["w1"], consts["b1"], consts["s1"],
                    consts["w2"], consts["b2"], consts["wf1"], consts["bf1"],
                    consts["wf2"], consts["bf2"], consts["wf34"], consts["bf34"])

        in_specs = [pl.BlockSpec((1, cfg.K * cfg.K * cfg.Cin, cfg.LS1),
                                 lambda i: (i, 0, 0))]
        in_specs += [_const_spec(op.shape) for op in operands[1:]]

        out = pl.pallas_call(
            kernel,
            out_shape=jax.ShapeDtypeStruct((cfg.N, out_rows, 128), jnp.float32),
            grid=(cfg.N,),
            in_specs=in_specs,
            out_specs=pl.BlockSpec((1, out_rows, 128), lambda i: (i, 0, 0)),
            scratch_shapes=[pltpu.VMEM((cfg.K * cfg.K * cfg.Cg, cfg.LT2),
                                       jnp.float32)],
            compiler_params=pltpu.CompilerParams(
                dimension_semantics=("parallel",),
                vmem_limit_bytes=32 * 1024 * 1024),
        )(*operands)

        v = out[:, 0:cfg.out_chan, 0]
        s = out[:, cfg.out_chan:2 * cfg.out_chan, 0]
        return v, s

    return forward


# ----------------------------------------------------------------------------
# Pure-JAX reference (for in-script correctness check)
# ----------------------------------------------------------------------------
def _reference_forward(params, x):
    hp = lax.Precision.HIGHEST

    def conv(x, w, b):
        y = lax.conv_general_dilated(
            x, w, window_strides=(1, 1), padding=((1, 1), (1, 1)),
            dimension_numbers=("NCHW", "OIHW", "NCHW"), precision=hp)
        return jax.nn.relu(y + b[None, :, None, None])

    def pool(y):
        return lax.reduce_window(y, -jnp.inf, lax.max,
                                 (1, 1, 2, 2), (1, 1, 2, 2), "VALID")

    y = pool(conv(x, params["conv1_w"], params["conv1_b"]))
    y = pool(conv(y, params["conv2_w"], params["conv2_b"]))
    y = y.reshape(y.shape[0], -1)
    y = jax.nn.relu(jnp.dot(y, params["fc1_w"].T, precision=hp) + params["fc1_b"])
    y = jax.nn.relu(jnp.dot(y, params["fc2_w"].T, precision=hp) + params["fc2_b"])
    v = jnp.dot(y, params["fc3_w"].T, precision=hp) + params["fc3_b"]
    s = jnp.dot(y, params["fc4_w"].T, precision=hp) + params["fc4_b"]
    return v, s


if __name__ == "__main__":
    in_chan, out_chan, imsize, batch = 4, 3, 16, 2
    key = jax.random.PRNGKey(0)
    k_param, k_x = jax.random.split(key)
    params = init_params(k_param, in_chan, out_chan, imsize)
    x = jax.random.normal(k_x, (batch, in_chan, imsize, imsize), jnp.float32)

    consts, cfg = prepare_fused_params(params, in_chan, out_chan, imsize, batch)
    forward = make_lenet_kg_forward(cfg)

    v, s = forward(consts, x)
    jax.block_until_ready((v, s))
    assert v.shape == (batch, out_chan) and s.shape == (batch, out_chan)

    v_ref, s_ref = _reference_forward(params, x)
    np.testing.assert_allclose(np.asarray(v), np.asarray(v_ref), rtol=2e-2, atol=5e-3)
    np.testing.assert_allclose(np.asarray(s), np.asarray(s_ref), rtol=2e-2, atol=5e-3)

    print("KERNEL_OK")
</pallas_src>

<mosaic_0001>
module attributes {stable_mosaic.version = 11 : i64} {
  func.func @_lenet_fused_kernel(%arg0: i32, %arg1: memref<1x100x384xf32, #tpu.memory_space<vmem>>, %arg2: memref<6x100xf32, #tpu.memory_space<vmem>>, %arg3: memref<6x1xf32, #tpu.memory_space<vmem>>, %arg4: memref<324x256xbf16, #tpu.memory_space<vmem>>, %arg5: memref<16x200xf32, #tpu.memory_space<vmem>>, %arg6: memref<16x1xf32, #tpu.memory_space<vmem>>, %arg7: memref<120x64xf32, #tpu.memory_space<vmem>>, %arg8: memref<120x1xf32, #tpu.memory_space<vmem>>, %arg9: memref<84x120xf32, #tpu.memory_space<vmem>>, %arg10: memref<84x1xf32, #tpu.memory_space<vmem>>, %arg11: memref<6x84xf32, #tpu.memory_space<vmem>>, %arg12: memref<6x1xf32, #tpu.memory_space<vmem>>, %arg13: memref<1x8x128xf32, #tpu.memory_space<vmem>>, %arg14: memref<200x256xf32, #tpu.memory_space<vmem>>) attributes {dimension_semantics = [#tpu.dimension_semantics<parallel>], iteration_bounds = array<i64: 2>, scalar_prefetch = 0 : i64, scratch_operands = 1 : i64, tpu.core_type = #tpu.core_type<tc>, window_params = [{transform_indices = @transform_0, window_bounds = array<i64: 1, 100, 384>}, {pipeline_mode = #tpu.pipeline_mode<synchronous>, transform_indices = @transform_1, window_bounds = array<i64: 6, 100>}, {pipeline_mode = #tpu.pipeline_mode<synchronous>, transform_indices = @transform_2, window_bounds = array<i64: 6, 1>}, {pipeline_mode = #tpu.pipeline_mode<synchronous>, transform_indices = @transform_3, window_bounds = array<i64: 324, 256>}, {pipeline_mode = #tpu.pipeline_mode<synchronous>, transform_indices = @transform_4, window_bounds = array<i64: 16, 200>}, {pipeline_mode = #tpu.pipeline_mode<synchronous>, transform_indices = @transform_5, window_bounds = array<i64: 16, 1>}, {pipeline_mode = #tpu.pipeline_mode<synchronous>, transform_indices = @transform_6, window_bounds = array<i64: 120, 64>}, {pipeline_mode = #tpu.pipeline_mode<synchronous>, transform_indices = @transform_7, window_bounds = array<i64: 120, 1>}, {pipeline_mode = #tpu.pipeline_mode<synchronous>, transform_indices = @transform_8, window_bounds = array<i64: 84, 120>}, {pipeline_mode = #tpu.pipeline_mode<synchronous>, transform_indices = @transform_9, window_bounds = array<i64: 84, 1>}, {pipeline_mode = #tpu.pipeline_mode<synchronous>, transform_indices = @transform_10, window_bounds = array<i64: 6, 84>}, {pipeline_mode = #tpu.pipeline_mode<synchronous>, transform_indices = @transform_11, window_bounds = array<i64: 6, 1>}, {transform_indices = @transform_12, window_bounds = array<i64: 1, 8, 128>}]} {
    %c0 = arith.constant 0 : index
    %c0_0 = arith.constant 0 : index
    %0 = vector.load %arg2[%c0, %c0_0] : memref<6x100xf32, #tpu.memory_space<vmem>>, vector<6x100xf32>
    %c0_1 = arith.constant 0 : index
    %c0_2 = arith.constant 0 : index
    %c0_3 = arith.constant 0 : index
    %1 = vector.load %arg1[%c0_1, %c0_2, %c0_3] : memref<1x100x384xf32, #tpu.memory_space<vmem>>, vector<1x100x384xf32>
    %2 = vector.shape_cast %1 : vector<1x100x384xf32> to vector<100x384xf32>
    %cst = arith.constant dense<0.000000e+00> : vector<6x384xf32>
    %3 = tpu.matmul %0, %2, %cst {dimension_numbers = #tpu.dot_dimension_numbers<[1], [0], [0], [1], [0, 0, 1, 1], [], []>} : vector<6x100xf32>, vector<100x384xf32>, vector<6x384xf32> -> vector<6x384xf32>
    %c0_4 = arith.constant 0 : index
    %c0_5 = arith.constant 0 : index
    %4 = vector.load %arg3[%c0_4, %c0_5] : memref<6x1xf32, #tpu.memory_space<vmem>>, vector<6x1xf32>
    %5 = vector.broadcast %4 : vector<6x1xf32> to vector<6x384xf32>
    %6 = arith.addf %3, %5 : vector<6x384xf32>
    %cst_6 = arith.constant 0.000000e+00 : f32
    %7 = vector.broadcast %cst_6 : f32 to vector<6x384xf32>
    %8 = arith.maximumf %6, %7 : vector<6x384xf32>
    %9 = vector.extract_strided_slice %8 {offsets = [0, 0], sizes = [6, 324], strides = [1, 1]} : vector<6x384xf32> to vector<6x324xf32>
    %10 = vector.extract_strided_slice %8 {offsets = [0, 1], sizes = [6, 324], strides = [1, 1]} : vector<6x384xf32> to vector<6x324xf32>
    %11 = arith.maximumf %9, %10 : vector<6x324xf32>
    %12 = vector.extract_strided_slice %8 {offsets = [0, 18], sizes = [6, 324], strides = [1, 1]} : vector<6x384xf32> to vector<6x324xf32>
    %13 = vector.extract_strided_slice %8 {offsets = [0, 19], sizes = [6, 324], strides = [1, 1]} : vector<6x384xf32> to vector<6x324xf32>
    %14 = arith.maximumf %12, %13 : vector<6x324xf32>
    %15 = arith.maximumf %11, %14 : vector<6x324xf32>
    %16 = arith.truncf %15 : vector<6x324xf32> to vector<6x324xbf16>
    %c0_7 = arith.constant 0 : index
    %c0_8 = arith.constant 0 : index
    %17 = vector.load %arg4[%c0_7, %c0_8] : memref<324x256xbf16, #tpu.memory_space<vmem>>, vector<324x256xbf16>
    %cst_9 = arith.constant dense<0.000000e+00> : vector<6x256xf32>
    %18 = tpu.matmul %16, %17, %cst_9 {dimension_numbers = #tpu.dot_dimension_numbers<[1], [0], [0], [1], [0, 0, 1, 1], [], []>} : vector<6x324xbf16>, vector<324x256xbf16>, vector<6x256xf32> -> vector<6x256xf32>
    %cst_10 = arith.constant 0.000000e+00 : f32
    %19 = vector.broadcast %cst_10 : f32 to vector<200x256xf32>
    %c0_11 = arith.constant 0 : index
    %c0_12 = arith.constant 0 : index
    %20 = vector.load %arg14[%c0_11, %c0_12] : memref<200x256xf32, #tpu.memory_space<vmem>>, vector<200x256xf32>
    tpu.vector_store %arg14[%c0_11, %c0_12], %19 {strides = array<i32>} : memref<200x256xf32, #tpu.memory_space<vmem>>, vector<200x256xf32>,
    %21 = vector.extract_strided_slice %18 {offsets = [0, 0], sizes = [6, 91], strides = [1, 1]} : vector<6x256xf32> to vector<6x91xf32>
    %c0_13 = arith.constant 0 : index
    %c0_14 = arith.constant 0 : index
    %22 = vector.load %arg14[%c0_13, %c0_14] : memref<200x256xf32, #tpu.memory_space<vmem>>, vector<6x91xf32>
    tpu.vector_store %arg14[%c0_13, %c0_14], %21 {strides = array<i32>} : memref<200x256xf32, #tpu.memory_space<vmem>>, vector<6x91xf32>,
    %23 = vector.extract_strided_slice %18 {offsets = [0, 1], sizes = [6, 91], strides = [1, 1]} : vector<6x256xf32> to vector<6x91xf32>
    %c8 = arith.constant 8 : index
    %c0_15 = arith.constant 0 : index
    %24 = vector.load %arg14[%c8, %c0_15] : memref<200x256xf32, #tpu.memory_space<vmem>>, vector<6x91xf32>
    tpu.vector_store %arg14[%c8, %c0_15], %23 {strides = array<i32>} : memref<200x256xf32, #tpu.memory_space<vmem>>, vector<6x91xf32>,
    %25 = vector.extract_strided_slice %18 {offsets = [0, 2], sizes = [6, 91], strides = [1, 1]} : vector<6x256xf32> to vector<6x91xf32>
    %c16 = arith.constant 16 : index
    %c0_16 = arith.constant 0 : index
    %26 = vector.load %arg14[%c16, %c0_16] : memref<200x256xf32, #tpu.memory_space<vmem>>, vector<6x91xf32>
    tpu.vector_store %arg14[%c16, %c0_16], %25 {strides = array<i32>} : memref<200x256xf32, #tpu.memory_space<vmem>>, vector<6x91xf32>,
    %27 = vector.extract_strided_slice %18 {offsets = [0, 3], sizes = [6, 91], strides = [1, 1]} : vector<6x256xf32> to vector<6x91xf32>
    %c24 = arith.constant 24 : index
    %c0_17 = arith.constant 0 : index
    %28 = vector.load %arg14[%c24, %c0_17] : memref<200x256xf32, #tpu.memory_space<vmem>>, vector<6x91xf32>
    tpu.vector_store %arg14[%c24, %c0_17], %27 {strides = array<i32>} : memref<200x256xf32, #tpu.memory_space<vmem>>, vector<6x91xf32>,
    %29 = vector.extract_strided_slice %18 {offsets = [0, 4], sizes = [6, 91], strides = [1, 1]} : vector<6x256xf32> to vector<6x91xf32>
    %c32 = arith.constant 32 : index
    %c0_18 = arith.constant 0 : index
    %30 = vector.load %arg14[%c32, %c0_18] : memref<200x256xf32, #tpu.memory_space<vmem>>, vector<6x91xf32>
    tpu.vector_store %arg14[%c32, %c0_18], %29 {strides = array<i32>} : memref<200x256xf32, #tpu.memory_space<vmem>>, vector<6x91xf32>,
    %31 = vector.extract_strided_slice %18 {offsets = [0, 9], sizes = [6, 91], strides = [1, 1]} : vector<6x256xf32> to vector<6x91xf32>
    %c40 = arith.constant 40 : index
    %c0_19 = arith.constant 0 : index
    %32 = vector.load %arg14[%c40, %c0_19] : memref<200x256xf32, #tpu.memory_space<vmem>>, vector<6x91xf32>
    tpu.vector_store %arg14[%c40, %c0_19], %31 {strides = array<i32>} : memref<200x256xf32, #tpu.memory_space<vmem>>, vector<6x91xf32>,
    %33 = vector.extract_strided_slice %18 {offsets = [0, 10], sizes = [6, 91], strides = [1, 1]} : vector<6x256xf32> to vector<6x91xf32>
    %c48 = arith.constant 48 : index
    %c0_20 = arith.constant 0 : index
    %34 = vector.load %arg14[%c48, %c0_20] : memref<200x256xf32, #tpu.memory_space<vmem>>, vector<6x91xf32>
    tpu.vector_store %arg14[%c48, %c0_20], %33 {strides = array<i32>} : memref<200x256xf32, #tpu.memory_space<vmem>>, vector<6x91xf32>,
    %35 = vector.extract_strided_slice %18 {offsets = [0, 11], sizes = [6, 91], strides = [1, 1]} : vector<6x256xf32> to vector<6x91xf32>
    %c56 = arith.constant 56 : index
    %c0_21 = arith.constant 0 : index
    %36 = vector.load %arg14[%c56, %c0_21] : memref<200x256xf32, #tpu.memory_space<vmem>>, vector<6x91xf32>
    tpu.vector_store %arg14[%c56, %c0_21], %35 {strides = array<i32>} : memref<200x256xf32, #tpu.memory_space<vmem>>, vector<6x91xf32>,
    %37 = vector.extract_strided_slice %18 {offsets = [0, 12], sizes = [6, 91], strides = [1, 1]} : vector<6x256xf32> to vector<6x91xf32>
    %c64 = arith.constant 64 : index
    %c0_22 = arith.constant 0 : index
    %38 = vector.load %arg14[%c64, %c0_22] : memref<200x256xf32, #tpu.memory_space<vmem>>, vector<6x91xf32>
    tpu.vector_store %arg14[%c64, %c0_22], %37 {strides = array<i32>} : memref<200x256xf32, #tpu.memory_space<vmem>>, vector<6x91xf32>,
    %39 = vector.extract_strided_slice %18 {offsets = [0, 13], sizes = [6, 91], strides = [1, 1]} : vector<6x256xf32> to vector<6x91xf32>
    %c72 = arith.constant 72 : index
    %c0_23 = arith.constant 0 : index
    %40 = vector.load %arg14[%c72, %c0_23] : memref<200x256xf32, #tpu.memory_space<vmem>>, vector<6x91xf32>
    tpu.vector_store %arg14[%c72, %c0_23], %39 {strides = array<i32>} : memref<200x256xf32, #tpu.memory_space<vmem>>, vector<6x91xf32>,
    %41 = vector.extract_strided_slice %18 {offsets = [0, 18], sizes = [6, 91], strides = [1, 1]} : vector<6x256xf32> to vector<6x91xf32>
    %c80 = arith.constant 80 : index
    %c0_24 = arith.constant 0 : index
    %42 = vector.load %arg14[%c80, %c0_24] : memref<200x256xf32, #tpu.memory_space<vmem>>, vector<6x91xf32>
    tpu.vector_store %arg14[%c80, %c0_24], %41 {strides = array<i32>} : memref<200x256xf32, #tpu.memory_space<vmem>>, vector<6x91xf32>,
    %43 = vector.extract_strided_slice %18 {offsets = [0, 19], sizes = [6, 91], strides = [1, 1]} : vector<6x256xf32> to vector<6x91xf32>
    %c88 = arith.constant 88 : index
    %c0_25 = arith.constant 0 : index
    %44 = vector.load %arg14[%c88, %c0_25] : memref<200x256xf32, #tpu.memory_space<vmem>>, vector<6x91xf32>
    tpu.vector_store %arg14[%c88, %c0_25], %43 {strides = array<i32>} : memref<200x256xf32, #tpu.memory_space<vmem>>, vector<6x91xf32>,
    %45 = vector.extract_strided_slice %18 {offsets = [0, 20], sizes = [6, 91], strides = [1, 1]} : vector<6x256xf32> to vector<6x91xf32>
    %c96 = arith.constant 96 : index
    %c0_26 = arith.constant 0 : index
    %46 = vector.load %arg14[%c96, %c0_26] : memref<200x256xf32, #tpu.memory_space<vmem>>, vector<6x91xf32>
    tpu.vector_store %arg14[%c96, %c0_26], %45 {strides = array<i32>} : memref<200x256xf32, #tpu.memory_space<vmem>>, vector<6x91xf32>,
    %47 = vector.extract_strided_slice %18 {offsets = [0, 21], sizes = [6, 91], strides = [1, 1]} : vector<6x256xf32> to vector<6x91xf32>
    %c104 = arith.constant 104 : index
    %c0_27 = arith.constant 0 : index
    %48 = vector.load %arg14[%c104, %c0_27] : memref<200x256xf32, #tpu.memory_space<vmem>>, vector<6x91xf32>
    tpu.vector_store %arg14[%c104, %c0_27], %47 {strides = array<i32>} : memref<200x256xf32, #tpu.memory_space<vmem>>, vector<6x91xf32>,
    %49 = vector.extract_strided_slice %18 {offsets = [0, 22], sizes = [6, 91], strides = [1, 1]} : vector<6x256xf32> to vector<6x91xf32>
    %c112 = arith.constant 112 : index
    %c0_28 = arith.constant 0 : index
    %50 = vector.load %arg14[%c112, %c0_28] : memref<200x256xf32, #tpu.memory_space<vmem>>, vector<6x91xf32>
    tpu.vector_store %arg14[%c112, %c0_28], %49 {strides = array<i32>} : memref<200x256xf32, #tpu.memory_space<vmem>>, vector<6x91xf32>,
    %51 = vector.extract_strided_slice %18 {offsets = [0, 27], sizes = [6, 91], strides = [1, 1]} : vector<6x256xf32> to vector<6x91xf32>
    %c120 = arith.constant 120 : index
    %c0_29 = arith.constant 0 : index
    %52 = vector.load %arg14[%c120, %c0_29] : memref<200x256xf32, #tpu.memory_space<vmem>>, vector<6x91xf32>
    tpu.vector_store %arg14[%c120, %c0_29], %51 {strides = array<i32>} : memref<200x256xf32, #tpu.memory_space<vmem>>, vector<6x91xf32>,
    %53 = vector.extract_strided_slice %18 {offsets = [0, 28], sizes = [6, 91], strides = [1, 1]} : vector<6x256xf32> to vector<6x91xf32>
    %c128 = arith.constant 128 : index
    %c0_30 = arith.constant 0 : index
    %54 = vector.load %arg14[%c128, %c0_30] : memref<200x256xf32, #tpu.memory_space<vmem>>, vector<6x91xf32>
    tpu.vector_store %arg14[%c128, %c0_30], %53 {strides = array<i32>} : memref<200x256xf32, #tpu.memory_space<vmem>>, vector<6x91xf32>,
    %55 = vector.extract_strided_slice %18 {offsets = [0, 29], sizes = [6, 91], strides = [1, 1]} : vector<6x256xf32> to vector<6x91xf32>
    %c136 = arith.constant 136 : index
    %c0_31 = arith.constant 0 : index
    %56 = vector.load %arg14[%c136, %c0_31] : memref<200x256xf32, #tpu.memory_space<vmem>>, vector<6x91xf32>
    tpu.vector_store %arg14[%c136, %c0_31], %55 {strides = array<i32>} : memref<200x256xf32, #tpu.memory_space<vmem>>, vector<6x91xf32>,
    %57 = vector.extract_strided_slice %18 {offsets = [0, 30], sizes = [6, 91], strides = [1, 1]} : vector<6x256xf32> to vector<6x91xf32>
    %c144 = arith.constant 144 : index
    %c0_32 = arith.constant 0 : index
    %58 = vector.load %arg14[%c144, %c0_32] : memref<200x256xf32, #tpu.memory_space<vmem>>, vector<6x91xf32>
    tpu.vector_store %arg14[%c144, %c0_32], %57 {strides = array<i32>} : memref<200x256xf32, #tpu.memory_space<vmem>>, vector<6x91xf32>,
    %59 = vector.extract_strided_slice %18 {offsets = [0, 31], sizes = [6, 91], strides = [1, 1]} : vector<6x256xf32> to vector<6x91xf32>
    %c152 = arith.constant 152 : index
    %c0_33 = arith.constant 0 : index
    %60 = vector.load %arg14[%c152, %c0_33] : memref<200x256xf32, #tpu.memory_space<vmem>>, vector<6x91xf32>
    tpu.vector_store %arg14[%c152, %c0_33], %59 {strides = array<i32>} : memref<200x256xf32, #tpu.memory_space<vmem>>, vector<6x91xf32>,
    %61 = vector.extract_strided_slice %18 {offsets = [0, 36], sizes = [6, 91], strides = [1, 1]} : vector<6x256xf32> to vector<6x91xf32>
    %c160 = arith.constant 160 : index
    %c0_34 = arith.constant 0 : index
    %62 = vector.load %arg14[%c160, %c0_34] : memref<200x256xf32, #tpu.memory_space<vmem>>, vector<6x91xf32>
    tpu.vector_store %arg14[%c160, %c0_34], %61 {strides = array<i32>} : memref<200x256xf32, #tpu.memory_space<vmem>>, vector<6x91xf32>,
    %63 = vector.extract_strided_slice %18 {offsets = [0, 37], sizes = [6, 91], strides = [1, 1]} : vector<6x256xf32> to vector<6x91xf32>
    %c168 = arith.constant 168 : index
    %c0_35 = arith.constant 0 : index
    %64 = vector.load %arg14[%c168, %c0_35] : memref<200x256xf32, #tpu.memory_space<vmem>>, vector<6x91xf32>
    tpu.vector_store %arg14[%c168, %c0_35], %63 {strides = array<i32>} : memref<200x256xf32, #tpu.memory_space<vmem>>, vector<6x91xf32>,
    %65 = vector.extract_strided_slice %18 {offsets = [0, 38], sizes = [6, 91], strides = [1, 1]} : vector<6x256xf32> to vector<6x91xf32>
    %c176 = arith.constant 176 : index
    %c0_36 = arith.constant 0 : index
    %66 = vector.load %arg14[%c176, %c0_36] : memref<200x256xf32, #tpu.memory_space<vmem>>, vector<6x91xf32>
    tpu.vector_store %arg14[%c176, %c0_36], %65 {strides = array<i32>} : memref<200x256xf32, #tpu.memory_space<vmem>>, vector<6x91xf32>,
    %67 = vector.extract_strided_slice %18 {offsets = [0, 39], sizes = [6, 91], strides = [1, 1]} : vector<6x256xf32> to vector<6x91xf32>
    %c184 = arith.constant 184 : index
    %c0_37 = arith.constant 0 : index
    %68 = vector.load %arg14[%c184, %c0_37] : memref<200x256xf32, #tpu.memory_space<vmem>>, vector<6x91xf32>
    tpu.vector_store %arg14[%c184, %c0_37], %67 {strides = array<i32>} : memref<200x256xf32, #tpu.memory_space<vmem>>, vector<6x91xf32>,
    %69 = vector.extract_strided_slice %18 {offsets = [0, 40], sizes = [6, 91], strides = [1, 1]} : vector<6x256xf32> to vector<6x91xf32>
    %c192 = arith.constant 192 : index
    %c0_38 = arith.constant 0 : index
    %70 = vector.load %arg14[%c192, %c0_38] : memref<200x256xf32, #tpu.memory_space<vmem>>, vector<6x91xf32>
    tpu.vector_store %arg14[%c192, %c0_38], %69 {strides = array<i32>} : memref<200x256xf32, #tpu.memory_space<vmem>>, vector<6x91xf32>,
    %c0_39 = arith.constant 0 : index
    %c0_40 = arith.constant 0 : index
    %71 = vector.load %arg5[%c0_39, %c0_40] : memref<16x200xf32, #tpu.memory_space<vmem>>, vector<16x200xf32>
    %c0_41 = arith.constant 0 : index
    %c0_42 = arith.constant 0 : index
    %72 = vector.load %arg14[%c0_41, %c0_42] : memref<200x256xf32, #tpu.memory_space<vmem>>, vector<200x256xf32>
    %cst_43 = arith.constant dense<0.000000e+00> : vector<16x256xf32>
    %73 = tpu.matmul %71, %72, %cst_43 {dimension_numbers = #tpu.dot_dimension_numbers<[1], [0], [0], [1], [0, 0, 1, 1], [], []>} : vector<16x200xf32>, vector<200x256xf32>, vector<16x256xf32> -> vector<16x256xf32>
    %c0_44 = arith.constant 0 : index
    %c0_45 = arith.constant 0 : index
    %74 = vector.load %arg6[%c0_44, %c0_45] : memref<16x1xf32, #tpu.memory_space<vmem>>, vector<16x1xf32>
    %75 = vector.broadcast %74 : vector<16x1xf32> to vector<16x256xf32>
    %76 = arith.addf %73, %75 : vector<16x256xf32>
    %cst_46 = arith.constant 0.000000e+00 : f32
    %77 = vector.broadcast %cst_46 : f32 to vector<16x256xf32>
    %78 = arith.maximumf %76, %77 : vector<16x256xf32>
    %79 = vector.extract_strided_slice %78 {offsets = [0, 0], sizes = [16, 81], strides = [1, 1]} : vector<16x256xf32> to vector<16x81xf32>
    %80 = vector.extract_strided_slice %78 {offsets = [0, 1], sizes = [16, 81], strides = [1, 1]} : vector<16x256xf32> to vector<16x81xf32>
    %81 = arith.maximumf %79, %80 : vector<16x81xf32>
    %82 = vector.extract_strided_slice %78 {offsets = [0, 9], sizes = [16, 81], strides = [1, 1]} : vector<16x256xf32> to vector<16x81xf32>
    %83 = vector.extract_strided_slice %78 {offsets = [0, 10], sizes = [16, 81], strides = [1, 1]} : vector<16x256xf32> to vector<16x81xf32>
    %84 = arith.maximumf %82, %83 : vector<16x81xf32>
    %85 = arith.maximumf %81, %84 : vector<16x81xf32>
    %86 = vector.extract_strided_slice %85 {offsets = [0, 0], sizes = [16, 1], strides = [1, 1]} : vector<16x81xf32> to vector<16x1xf32>
    %87 = vector.extract_strided_slice %85 {offsets = [0, 2], sizes = [16, 1], strides = [1, 1]} : vector<16x81xf32> to vector<16x1xf32>
    %88 = vector.extract_strided_slice %85 {offsets = [0, 18], sizes = [16, 1], strides = [1, 1]} : vector<16x81xf32> to vector<16x1xf32>
    %89 = vector.extract_strided_slice %85 {offsets = [0, 20], sizes = [16, 1], strides = [1, 1]} : vector<16x81xf32> to vector<16x1xf32>
    %90 = tpu.concatenate %86, %87, %88, %89 in 0 : vector<16x1xf32>, vector<16x1xf32>, vector<16x1xf32>, vector<16x1xf32> -> vector<64x1xf32>
    %c0_47 = arith.constant 0 : index
    %c0_48 = arith.constant 0 : index
    %91 = vector.load %arg7[%c0_47, %c0_48] : memref<120x64xf32, #tpu.memory_space<vmem>>, vector<120x64xf32>
    %cst_49 = arith.constant dense<0.000000e+00> : vector<120x1xf32>
    %92 = tpu.matmul %91, %90, %cst_49 {dimension_numbers = #tpu.dot_dimension_numbers<[1], [0], [0], [1], [0, 0, 1, 1], [], []>} : vector<120x64xf32>, vector<64x1xf32>, vector<120x1xf32> -> vector<120x1xf32>
    %c0_50 = arith.constant 0 : index
    %c0_51 = arith.constant 0 : index
    %93 = vector.load %arg8[%c0_50, %c0_51] : memref<120x1xf32, #tpu.memory_space<vmem>>, vector<120x1xf32>
    %94 = arith.addf %92, %93 : vector<120x1xf32>
    %cst_52 = arith.constant 0.000000e+00 : f32
    %95 = vector.broadcast %cst_52 : f32 to vector<120x1xf32>
    %96 = arith.maximumf %94, %95 : vector<120x1xf32>
    %c0_53 = arith.constant 0 : index
    %c0_54 = arith.constant 0 : index
    %97 = vector.load %arg9[%c0_53, %c0_54] : memref<84x120xf32, #tpu.memory_space<vmem>>, vector<84x120xf32>
    %cst_55 = arith.constant dense<0.000000e+00> : vector<84x1xf32>
    %98 = tpu.matmul %97, %96, %cst_55 {dimension_numbers = #tpu.dot_dimension_numbers<[1], [0], [0], [1], [0, 0, 1, 1], [], []>} : vector<84x120xf32>, vector<120x1xf32>, vector<84x1xf32> -> vector<84x1xf32>
    %c0_56 = arith.constant 0 : index
    %c0_57 = arith.constant 0 : index
    %99 = vector.load %arg10[%c0_56, %c0_57] : memref<84x1xf32, #tpu.memory_space<vmem>>, vector<84x1xf32>
    %100 = arith.addf %98, %99 : vector<84x1xf32>
    %cst_58 = arith.constant 0.000000e+00 : f32
    %101 = vector.broadcast %cst_58 : f32 to vector<84x1xf32>
    %102 = arith.maximumf %100, %101 : vector<84x1xf32>
    %c0_59 = arith.constant 0 : index
    %c0_60 = arith.constant 0 : index
    %103 = vector.load %arg11[%c0_59, %c0_60] : memref<6x84xf32, #tpu.memory_space<vmem>>, vector<6x84xf32>
    %cst_61 = arith.constant dense<0.000000e+00> : vector<6x1xf32>
    %104 = tpu.matmul %103, %102, %cst_61 {dimension_numbers = #tpu.dot_dimension_numbers<[1], [0], [0], [1], [0, 0, 1, 1], [], []>} : vector<6x84xf32>, vector<84x1xf32>, vector<6x1xf32> -> vector<6x1xf32>
    %c0_62 = arith.constant 0 : index
    %c0_63 = arith.constant 0 : index
    %105 = vector.load %arg12[%c0_62, %c0_63] : memref<6x1xf32, #tpu.memory_space<vmem>>, vector<6x1xf32>
    %106 = arith.addf %104, %105 : vector<6x1xf32>
    %cst_64 = arith.constant 0.000000e+00 : f32
    %107 = vector.broadcast %cst_64 : f32 to vector<1x8x128xf32>
    %c0_65 = arith.constant 0 : index
    %c0_66 = arith.constant 0 : index
    %c0_67 = arith.constant 0 : index
    %108 = vector.load %arg13[%c0_65, %c0_66, %c0_67] : memref<1x8x128xf32, #tpu.memory_space<vmem>>, vector<1x8x128xf32>
    tpu.vector_store %arg13[%c0_65, %c0_66, %c0_67], %107 {strides = array<i32>} : memref<1x8x128xf32, #tpu.memory_space<vmem>>, vector<1x8x128xf32>,
    %109 = vector.shape_cast %106 : vector<6x1xf32> to vector<1x6x1xf32>
    %c0_68 = arith.constant 0 : index
    %c0_69 = arith.constant 0 : index
    %c0_70 = arith.constant 0 : index
    %110 = vector.load %arg13[%c0_68, %c0_69, %c0_70] : memref<1x8x128xf32, #tpu.memory_space<vmem>>, vector<1x6x1xf32>
    tpu.vector_store %arg13[%c0_68, %c0_69, %c0_70], %109 {strides = array<i32>} : memref<1x8x128xf32, #tpu.memory_space<vmem>>, vector<1x6x1xf32>,
    return
  }
  func.func @transform_0(%arg0: i32) -> (i32, i32, i32) {
    %c0_i32 = arith.constant 0 : i32
    %c0_i32_0 = arith.constant 0 : i32
    %c0_i32_1 = arith.constant 0 : i32
    return %arg0, %c0_i32, %c0_i32_0 : i32, i32, i32
  }
  func.func @transform_1(%arg0: i32) -> (i32, i32) {
    %c0_i32 = arith.constant 0 : i32
    %c0_i32_0 = arith.constant 0 : i32
    %c0_i32_1 = arith.constant 0 : i32
    return %c0_i32, %c0_i32_0 : i32, i32
  }
  func.func @transform_2(%arg0: i32) -> (i32, i32) {
    %c0_i32 = arith.constant 0 : i32
    %c0_i32_0 = arith.constant 0 : i32
    %c0_i32_1 = arith.constant 0 : i32
    return %c0_i32, %c0_i32_0 : i32, i32
  }
  func.func @transform_3(%arg0: i32) -> (i32, i32) {
    %c0_i32 = arith.constant 0 : i32
    %c0_i32_0 = arith.constant 0 : i32
    %c0_i32_1 = arith.constant 0 : i32
    return %c0_i32, %c0_i32_0 : i32, i32
  }
  func.func @transform_4(%arg0: i32) -> (i32, i32) {
    %c0_i32 = arith.constant 0 : i32
    %c0_i32_0 = arith.constant 0 : i32
    %c0_i32_1 = arith.constant 0 : i32
    return %c0_i32, %c0_i32_0 : i32, i32
  }
  func.func @transform_5(%arg0: i32) -> (i32, i32) {
    %c0_i32 = arith.constant 0 : i32
    %c0_i32_0 = arith.constant 0 : i32
    %c0_i32_1 = arith.constant 0 : i32
    return %c0_i32, %c0_i32_0 : i32, i32
  }
  func.func @transform_6(%arg0: i32) -> (i32, i32) {
    %c0_i32 = arith.constant 0 : i32
    %c0_i32_0 = arith.constant 0 : i32
    %c0_i32_1 = arith.constant 0 : i32
    return %c0_i32, %c0_i32_0 : i32, i32
  }
  func.func @transform_7(%arg0: i32) -> (i32, i32) {
    %c0_i32 = arith.constant 0 : i32
    %c0_i32_0 = arith.constant 0 : i32
    %c0_i32_1 = arith.constant 0 : i32
    return %c0_i32, %c0_i32_0 : i32, i32
  }
  func.func @transform_8(%arg0: i32) -> (i32, i32) {
    %c0_i32 = arith.constant 0 : i32
    %c0_i32_0 = arith.constant 0 : i32
    %c0_i32_1 = arith.constant 0 : i32
    return %c0_i32, %c0_i32_0 : i32, i32
  }
  func.func @transform_9(%arg0: i32) -> (i32, i32) {
    %c0_i32 = arith.constant 0 : i32
    %c0_i32_0 = arith.constant 0 : i32
    %c0_i32_1 = arith.constant 0 : i32
    return %c0_i32, %c0_i32_0 : i32, i32
  }
  func.func @transform_10(%arg0: i32) -> (i32, i32) {
    %c0_i32 = arith.constant 0 : i32
    %c0_i32_0 = arith.constant 0 : i32
    %c0_i32_1 = arith.constant 0 : i32
    return %c0_i32, %c0_i32_0 : i32, i32
  }
  func.func @transform_11(%arg0: i32) -> (i32, i32) {
    %c0_i32 = arith.constant 0 : i32
    %c0_i32_0 = arith.constant 0 : i32
    %c0_i32_1 = arith.constant 0 : i32
    return %c0_i32, %c0_i32_0 : i32, i32
  }
  func.func @transform_12(%arg0: i32) -> (i32, i32, i32) {
    %c0_i32 = arith.constant 0 : i32
    %c0_i32_0 = arith.constant 0 : i32
    %c0_i32_1 = arith.constant 0 : i32
    return %arg0, %c0_i32, %c0_i32_0 : i32, i32, i32
  }
}

</mosaic_0001>

<bundles_post_ra>
// kernel: forward.1
= control target key start
LH: loop header
LB: loop body
LE: loop exit
PB: predicated region body
PF: predicated region fallthrough
CT: control target
= control target key end

     0   :  { %s2452_s21 = smov 0   ;;  %s3113_s0 = inlined_call_operand.vmem [shape: f32[2,100,384], index: 0, kind: input, shape index: {}]   ;;  %s3114_s1 = inlined_call_operand.vmem [shape: f32[6,100], index: 1, kind: input, shape index: {}]   ;;  %s3115_s2 = inlined_call_operand.vmem [shape: f32[6,1], index: 2, kind: input, shape index: {}]   ;;  %s3116_s3 = inlined_call_operand.vmem [shape: bf16[324,256], index: 3, kind: input, shape index: {}]   ;;  %s3117_s4 = inlined_call_operand.vmem [shape: f32[16,200], index: 4, kind: input, shape index: {}]   ;;  %s3118_s5 = inlined_call_operand.vmem [shape: f32[16,1], index: 5, kind: input, shape index: {}]   ;;  %s3119_s6 = inlined_call_operand.vmem [shape: f32[120,64], index: 6, kind: input, shape index: {}]   ;;  %s3120_s7 = inlined_call_operand.vmem [shape: f32[120,1], index: 7, kind: input, shape index: {}]   ;;  %s3121_s8 = inlined_call_operand.vmem [shape: f32[84,120], index: 8, kind: input, shape index: {}]   ;;  %s3122_s9 = inlined_call_operand.vmem [shape: f32[84,1], index: 9, kind: input, shape index: {}]   ;;  %s3123_s10 = inlined_call_operand.vmem [shape: f32[6,84], index: 10, kind: input, shape index: {}]   ;;  %s3124_s11 = inlined_call_operand.vmem [shape: f32[6,1], index: 11, kind: input, shape index: {}]   ;;  %s3125_s12 = inlined_call_operand.vmem [shape: f32[2,8,128], index: 12, kind: output, shape index: {}]  }
   0x1 LB: > { %s1900_s22 = sadd.s32 4294967295, %s2358_s21   ;;  %p1904_p0 = scmp.ge.s32.totalorder %s2358_s21, 1  ;;  %s2358_s21 = sphi %s2452_s21, %s22_s21  }
   0x2   : > { %p362_p1 = scmp.lt.s32.totalorder %s2358_s21, 3 }
   0x4   : > { %p363_p2 = pnand %p1904_p0, %p362_p1 }
   0x5   : > { %p2462_p3 = scmp.lt.s32.totalorder (!%p363_p2), %s1900_s22, 1  ;;  %s2363_s20 = smov (!%p363_p2), 127  }
   0x6   : > { %366 = sbr.rel (%p363_p2) target bundleno = 2161 (0x871), region = 68  ;;  %s2364_s24 = smov (!%p363_p2), 110  }
   0x7   : > { %s2365_s25 = smov (!%p363_p2), 106   ;;  %s2367_s27 = smov (!%p363_p2), 108  }
   0x8   : > { %s2368_s28 = smov (!%p363_p2), 107   ;;  %s2370_s30 = smov (!%p363_p2), 116  }
   0x9   : > { %s2371_s13 = smov (!%p363_p2), 115   ;;  %s2372_s14 = smov (!%p363_p2), 118  }
   0xa   : > { %s2373_s15 = smov (!%p363_p2), 117   ;;  %s2374_s16 = smov (!%p363_p2), 124  }
   0xb   : > { %v2360_v0 = vmov 0.0   ;;  %v453_v1 = vld [vmem:[%s3115_s2] sm:$0x3f]  ;;  %s3128_s22 = smov (!%p2462_p3, %s1900_s22), 1  ;;  %vm2361_vm0 = vmmov 0   ;;  %v2362_v2 = vmov 0  }
   0xc   : > { %2063 = vmatprep.subr.mxu1 %v2360_v0  ;;  %995 = vst [vmem:[#allocation2] sm:$0xff] %v2360_v0  ;;  %996 = vst [vmem:[#allocation2 + $0x8] sm:$0xff] %v2360_v0  ;;  %537 = vmatprep.mubr.f32.mxu0 %v2360_v0  ;;  %s2241_s26 = smul.u32 312, %s3128_s22  ;;  %vm463_vm1 = vcmask 1043456   ;;  %v413_v42 = vld [vmem:[%s3114_s1] sm:$0x3f] }
   0xd   : > { %997 = vst [vmem:[#allocation2 + $0x10] sm:$0xff] %v2360_v0  ;;  %999 = vst [vmem:[#allocation2 + $0x20] sm:$0xff] %v2360_v0  ;;  %2089 = vmatprep.mubr.msk.f32.mxu1 %vm2361_vm0, %v2360_v0  ;;  %2277 = vset.pattern.permute.xlu0 %v2362_v2  ;;  %vm459_vm2 = vcmask 818176   ;;  %v2289_v53 = vld [vmem:[%s3116_s3 + $0x70] ss:$8 sps:$4 sm:$0xff]   ;;  %vm906_vm3 = vcmask 1041408  }
   0xe   : > { %1001 = vst [vmem:[#allocation2 + $0x30] sm:$0xff] %v2360_v0  ;;  %1003 = vst [vmem:[#allocation2 + $0x40] sm:$0xff] %v2360_v0  ;;  %456 = vperm.xlu0 %2277, %v453_v1   ;;  %2288 = vset.pattern.permute.xlu1 %v2362_v2  ;;  %s2511_s29 = scalar_lea.vmem %s3113_s0, %s2241_s26  ;;  %v2291_v54 = vld [vmem:[%s3116_s3 + $0x74] ss:$8 sps:$4 sm:$0xff]   ;;  %v2294_v55 = vld [vmem:[%s3116_s3 + $0x64] ss:$8 sps:$4 sm:$0xff]  }
   0xf   : > { %1005 = vst [vmem:[#allocation2 + $0x50] sm:$0xff] %v2360_v0  ;;  %1007 = vst [vmem:[#allocation2 + $0x60] sm:$0xff] %v2360_v0  ;;  %v451_v3 = vld [vmem:[%s2511_s29 + $0x128] sm:$0xf]  ;;  %v450_v4 = vld [vmem:[%s2511_s29 + $0x120] sm:$0xf] }
  0x10   : > { %1009 = vst [vmem:[#allocation2 + $0x70] sm:$0xff] %v2360_v0  ;;  %1011 = vst [vmem:[#allocation2 + $0x80] sm:$0xff] %v2360_v0  ;;  %v452_v5 = vld [vmem:[%s2511_s29 + $0x130] sm:$0xf]  ;;  %1907 = vmatprep.subr.msk.mxu0 %vm463_vm1, %v451_v3  ;;  %v447_v7 = vld [vmem:[%s2511_s29 + $0x108] sm:$0xff]  ;;  %vm626_vm4 = vcmask 1039360  }
  0x11   : > { %1013 = vst [vmem:[#allocation2 + $0x90] sm:$0xff] %v2360_v0  ;;  %1015 = vst [vmem:[#allocation2 + $0xa0] sm:$0xff] %v2360_v0  ;;  %2064 = vmatpush3.msk.msra.mxu1 %vm463_vm1, %v452_v5  ;;  %v448_v6 = vld [vmem:[%s2511_s29 + $0x110] sm:$0xff]  ;;  %v449_v8 = vld [vmem:[%s2511_s29 + $0x118] sm:$0xff]  ;;  %1908 = vmatpush1.msk.msra.mxu0 %vm463_vm1, %v450_v4  ;;  %vm644_vm5 = vcmask 900096   ;;  %vm902_vm6 = vcmask 556032  }
  0x12   : > { %1017 = vst [vmem:[#allocation2 + $0xb0] sm:$0xff] %v2360_v0  ;;  %1019 = vst [vmem:[#allocation2 + $0xc0] sm:$0xff] %v2360_v0  ;;  %2065 = vmatprep.subr.mxu1 %v2360_v0  ;;  %v445_v9 = vld [vmem:[%s2511_s29 + $0xf8] sm:$0xff]  ;;  %v446_v10 = vld [vmem:[%s2511_s29 + $0x100] sm:$0xff]  ;;  %481 = vmatprep.subr.mxu0 %v448_v6  ;;  %vm1045_vm7 = vcmask 742400   ;;  %s2366_s26 = smov 101  }
  0x13   : > { %1021 = vst [vmem:[#allocation2 + $0xd0] sm:$0xff] %v2360_v0  ;;  %1023 = vst [vmem:[#allocation2 + $0xe0] sm:$0xff] %v2360_v0  ;;  %2066 = vmatpush3.msra.mxu1 %v449_v8  ;;  %v444_v11 = vld [vmem:[%s2511_s29 + $0xf0] sm:$0xff]  ;;  %482 = vmatpush1.msra.mxu0 %v447_v7  ;;  %v442_v12 = vld [vmem:[%s2511_s29 + $0xe0] sm:$0xff]  ;;  %s2375_s17 = smov 119   ;;  %s2376_s18 = smov 126  }
  0x14   : > { %1025 = vst [vmem:[#allocation2 + $0xf0] sm:$0xff] %v2360_v0  ;;  %1027 = vst [vmem:[#allocation2 + $0x100] sm:$0xff] %v2360_v0  ;;  %2067 = vmatprep.subr.mxu1 %v2360_v0  ;;  %v443_v13 = vld [vmem:[%s2511_s29 + $0xe8] sm:$0xff]  ;;  %483 = vmatprep.subr.mxu0 %v445_v9  ;;  %v441_v14 = vld [vmem:[%s2511_s29 + $0xd8] sm:$0xff]  ;;  %s2377_s19 = smov 125   ;;  %s2378_s23 = smov 88  }
  0x15   : > { %1029 = vst [vmem:[#allocation2 + $0x110] sm:$0xff] %v2360_v0  ;;  %1031 = vst [vmem:[#allocation2 + $0x120] sm:$0xff] %v2360_v0  ;;  %2068 = vmatpush3.msra.mxu1 %v446_v10  ;;  %484 = vmatpush1.msra.mxu0 %v444_v11  ;;  %v439_v15 = vld [vmem:[%s2511_s29 + $0xc8] sm:$0xff]  ;;  %v440_v16 = vld [vmem:[%s2511_s29 + $0xd0] sm:$0xff]  ;;  %vm1223_vm8 = vcmask 588800   ;;  %vm1153_vm9 = vcmask 719872  }
  0x16   : > { %1033 = vst [vmem:[#allocation2 + $0x130] sm:$0xff] %v2360_v0  ;;  %1035 = vst [vmem:[#allocation2 + $0x140] sm:$0xff] %v2360_v0  ;;  %2069 = vmatprep.subr.mxu1 %v2360_v0  ;;  %485 = vmatprep.subr.mxu0 %v442_v12  ;;  %v438_v17 = vld [vmem:[%s2511_s29 + $0xc0] sm:$0xff]  ;;  %v436_v18 = vld [vmem:[%s2511_s29 + $0xb0] sm:$0xff]  ;;  %vm1145_vm10 = vcmask 728064   ;;  %vm1137_vm11 = vcmask 736256  }
  0x17   : > { %1037 = vst [vmem:[#allocation2 + $0x150] sm:$0xff] %v2360_v0  ;;  %1039 = vst [vmem:[#allocation2 + $0x160] sm:$0xff] %v2360_v0  ;;  %2070 = vmatpush3.msra.mxu1 %v443_v13  ;;  %486 = vmatpush1.msra.mxu0 %v441_v14  ;;  %v437_v19 = vld [vmem:[%s2511_s29 + $0xb8] sm:$0xff]  ;;  %v435_v20 = vld [vmem:[%s2511_s29 + $0xa8] sm:$0xff]  ;;  %vm1377_vm12 = vcmask 523264   ;;  %vm1600_vm13 = vcmask 982016  }
  0x18   : > { %1041 = vst [vmem:[#allocation2 + $0x170] sm:$0xff] %v2360_v0  ;;  %1043 = vst [vmem:[#allocation2 + $0x180] sm:$0xff] %v2360_v0  ;;  %2071 = vmatprep.subr.mxu1 %v2360_v0  ;;  %487 = vmatprep.subr.mxu0 %v439_v15  ;;  %v433_v21 = vld [vmem:[%s2511_s29 + $0x98] sm:$0xff]  ;;  %v434_v22 = vld [vmem:[%s2511_s29 + $0xa0] sm:$0xff]  ;;  %vm1767_vm14 = vcmask 687104   ;;  %vm1845_vm15 = vcmask 5120  }
  0x19   : > { %2072 = vmatpush3.msra.mxu1 %v440_v16  ;;  %488 = vmatpush1.msra.mxu0 %v438_v17  ;;  %v432_v23 = vld [vmem:[%s2511_s29 + $0x90] sm:$0xff]  ;;  %v430_v24 = vld [vmem:[%s2511_s29 + $0x80] sm:$0xff]  ;;  %v429_v25 = vld [vmem:[%s2511_s29 + $0x78] sm:$0xff] }
  0x1a   : > { %2073 = vmatprep.subr.mxu1 %v2360_v0  ;;  %489 = vmatprep.subr.mxu0 %v436_v18  ;;  %v431_v26 = vld [vmem:[%s2511_s29 + $0x88] sm:$0xff]  ;;  %v428_v28 = vld [vmem:[%s2511_s29 + $0x70] sm:$0xff]  ;;  %v426_v29 = vld [vmem:[%s2511_s29 + $0x60] sm:$0xff] }
  0x1b   : > { %2074 = vmatpush3.msra.mxu1 %v437_v19  ;;  %490 = vmatpush1.msra.mxu0 %v435_v20  ;;  %v427_v27 = vld [vmem:[%s2511_s29 + $0x68] sm:$0xff]  ;;  %v424_v30 = vld [vmem:[%s2511_s29 + $0x50] sm:$0xff]  ;;  %v425_v31 = vld [vmem:[%s2511_s29 + $0x58] sm:$0xff] }
  0x1c   : > { %2075 = vmatprep.subr.mxu1 %v2360_v0  ;;  %491 = vmatprep.subr.mxu0 %v433_v21  ;;  %v423_v32 = vld [vmem:[%s2511_s29 + $0x48] sm:$0xff]  ;;  %v421_v33 = vld [vmem:[%s2511_s29 + $0x38] sm:$0xff]  ;;  %v422_v34 = vld [vmem:[%s2511_s29 + $0x40] sm:$0xff] }
  0x1d   : > { %2076 = vmatpush3.msra.mxu1 %v434_v22  ;;  %492 = vmatpush1.msra.mxu0 %v432_v23  ;;  %v420_v35 = vld [vmem:[%s2511_s29 + $0x30] sm:$0xff]  ;;  %v418_v36 = vld [vmem:[%s2511_s29 + $0x20] sm:$0xff]  ;;  %v419_v37 = vld [vmem:[%s2511_s29 + $0x28] sm:$0xff] }
  0x1e   : > { %2077 = vmatprep.subr.mxu1 %v2360_v0  ;;  %493 = vmatprep.subr.mxu0 %v430_v24  ;;  %v417_v38 = vld [vmem:[%s2511_s29 + $0x18] sm:$0xff]  ;;  %v415_v39 = vld [vmem:[%s2511_s29 + $0x8] sm:$0xff]  ;;  %v416_v40 = vld [vmem:[%s2511_s29 + $0x10] sm:$0xff] }
  0x1f   : > { %2078 = vmatpush3.msra.mxu1 %v431_v26  ;;  %494 = vmatpush1.msra.mxu0 %v429_v25  ;;  %v414_v41 = vld [vmem:[%s2511_s29] sm:$0xff]  ;;  %v2297_v59 = vld [vmem:[%s3116_s3 + $0x54] ss:$8 sps:$4 sm:$0xff]   ;;  %v2295_v60 = vld [vmem:[%s3116_s3 + $0x50] ss:$8 sps:$4 sm:$0xff]   ;;  %s2369_s29 = smov 109  }
  0x20   : > { %2079 = vmatprep.subr.mxu1 %v2360_v0  ;;  %495 = vmatprep.subr.mxu0 %v427_v27  ;;  %v2292_v57 = vld [vmem:[%s3116_s3 + $0x60] ss:$8 sps:$4 sm:$0xff]   ;;  %v2300_v61 = vld [vmem:[%s3116_s3 + $0x44] ss:$8 sps:$4 sm:$0xff]   ;;  %v2303_v5 = vld [vmem:[%s3116_s3 + $0x34] ss:$8 sps:$4 sm:$0xff]  }
  0x21   : > { %2080 = vmatpush3.msra.mxu1 %v428_v28  ;;  %496 = vmatpush1.msra.mxu0 %v426_v29  ;;  %v696_v62 = vld [vmem:[%s3116_s3 + $0x140] sm:$0x33]  ;;  %v2327_v6 = vld [vmem:[%s3116_s3 + $0x130] ss:$8 sps:$4 sm:$0xff]   ;;  %v2309_v12 = vld [vmem:[%s3116_s3 + $0x14] ss:$8 sps:$4 sm:$0xff]  }
  0x22   : > { %2081 = vmatprep.subr.mxu1 %v2360_v0  ;;  %497 = vmatprep.subr.mxu0 %v424_v30  ;;  %v1953_v63 = vcombine.high %v696_v62, %v696_v62  ;;  %v1952_v1 = vcombine.low %v696_v62, %v696_v62  ;;  %v2298_v3 = vld [vmem:[%s3116_s3 + $0x40] ss:$8 sps:$4 sm:$0xff]   ;;  %v2335_v7 = vld [vmem:[%s3116_s3 + $0x124] ss:$8 sps:$4 sm:$0xff]   ;;  %v2301_v8 = vld [vmem:[%s3116_s3 + $0x30] ss:$8 sps:$4 sm:$0xff]  }
  0x23   : > { %2082 = vmatpush3.msra.mxu1 %v425_v31  ;;  %498 = vmatpush1.msra.mxu0 %v423_v32  ;;  %v2306_v9 = vld [vmem:[%s3116_s3 + $0x24] ss:$8 sps:$4 sm:$0xff]   ;;  %v2333_v10 = vld [vmem:[%s3116_s3 + $0x120] ss:$8 sps:$4 sm:$0xff]   ;;  %v2307_v13 = vld [vmem:[%s3116_s3 + $0x10] ss:$8 sps:$4 sm:$0xff]  }
  0x24   : > { %2083 = vmatprep.subr.mxu1 %v2360_v0  ;;  %499 = vmatprep.subr.mxu0 %v421_v33  ;;  %v908_v4 = vsel %vm906_vm3, %v1952_v1, 0  ;;  %v2304_v11 = vld [vmem:[%s3116_s3 + $0x20] ss:$8 sps:$4 sm:$0xff]   ;;  %v2312_v14 = vld [vmem:[%s3116_s3 + $0x4] ss:$8 sps:$4 sm:$0xff]  }
  0x25   : > { %2084 = vmatpush3.msra.mxu1 %v422_v34  ;;  %500 = vmatpush1.msra.mxu0 %v420_v35  ;;  %v2310_v15 = vld [vmem:[%s3116_s3] ss:$8 sps:$4 sm:$0xff]   ;;  %v2315_v16 = vld [vmem:[%s3116_s3 + $0xf4] ss:$8 sps:$4 sm:$0xff]   ;;  %v2313_v17 = vld [vmem:[%s3116_s3 + $0xf0] ss:$8 sps:$4 sm:$0xff]  }
  0x26   : > { %2085 = vmatprep.subr.mxu1 %v2360_v0  ;;  %501 = vmatprep.subr.mxu0 %v418_v36  ;;  %v2318_v18 = vld [vmem:[%s3116_s3 + $0xe4] ss:$8 sps:$4 sm:$0xff]   ;;  %v2316_v19 = vld [vmem:[%s3116_s3 + $0xe0] ss:$8 sps:$4 sm:$0xff]   ;;  %v2321_v20 = vld [vmem:[%s3116_s3 + $0xd4] ss:$8 sps:$4 sm:$0xff]  }
  0x27   : > { %2086 = vmatpush3.msra.mxu1 %v419_v37  ;;  %502 = vmatpush1.msra.mxu0 %v417_v38  ;;  %v2319_v21 = vld [vmem:[%s3116_s3 + $0xd0] ss:$8 sps:$4 sm:$0xff]   ;;  %v2326_v22 = vld [vmem:[%s3116_s3 + $0xc4] ss:$8 sps:$4 sm:$0xff]   ;;  %v2324_v23 = vld [vmem:[%s3116_s3 + $0xc0] ss:$8 sps:$4 sm:$0xff]  }
  0x28   : > { %2087 = vmatprep.subr.mxu1 %v2360_v0  ;;  %503 = vmatprep.subr.mxu0 %v415_v39  ;;  %v2332_v24 = vld [vmem:[%s3116_s3 + $0xb4] ss:$8 sps:$4 sm:$0xff]   ;;  %v2330_v25 = vld [vmem:[%s3116_s3 + $0xb0] ss:$8 sps:$4 sm:$0xff]   ;;  %v2338_v26 = vld [vmem:[%s3116_s3 + $0xa4] ss:$8 sps:$4 sm:$0xff]  }
  0x29   : > { %2088 = vmatpush3.msra.mxu1 %v416_v40  ;;  %504 = vmatpush1.msra.mxu0 %v414_v41  ;;  %v2336_v27 = vld [vmem:[%s3116_s3 + $0xa0] ss:$8 sps:$4 sm:$0xff]   ;;  %v2341_v28 = vld [vmem:[%s3116_s3 + $0x114] ss:$8 sps:$4 sm:$0xff]   ;;  %v2339_v29 = vld [vmem:[%s3116_s3 + $0x110] ss:$8 sps:$4 sm:$0xff]  }
  0x2a   : > { %2090 = vmatmul.mubr.msk.f32.vlgmr.msra.gmra.mxu1 %vm459_vm2, %v413_v42  ;;  %1909 = vmatmul.mubr.msk.f32.vlgmr.msra.gmra.mxu0 %vm459_vm2, %v413_v42  ;;  %v2344_v30 = vld [vmem:[%s3116_s3 + $0x94] ss:$8 sps:$4 sm:$0xff]   ;;  %v2342_v31 = vld [vmem:[%s3116_s3 + $0x90] ss:$8 sps:$4 sm:$0xff]   ;;  %v2347_v32 = vld [vmem:[%s3116_s3 + $0x104] ss:$8 sps:$4 sm:$0xff]  }
  0x2b   : > { %986 = vmatprep.mubr.bf16.mxu1 %v2362_v2  ;;  %913 = vmatprep.subr.bf16.mxu0 %v2291_v54  ;;  %v2329_v2 = vld [vmem:[%s3116_s3 + $0x134] ss:$8 sps:$4 sm:$0xff]   ;;  %v2345_v33 = vld [vmem:[%s3116_s3 + $0x100] ss:$8 sps:$4 sm:$0xff]   ;;  %v2350_v34 = vld [vmem:[%s3116_s3 + $0x84] ss:$8 sps:$4 sm:$0xff]  }
  0x2c   : > { %914 = vmatpush1.bf16.msra.mxu0 %v2289_v53  ;;  %1954 = vmatprep.subr.msk.bf16.mxu1 %vm906_vm3, %v1953_v63  ;;  %v2348_v35 = vld [vmem:[%s3116_s3 + $0x80] ss:$8 sps:$4 sm:$0xff]  }
  0x2d   : > { %915 = vmatprep.subr.bf16.mxu0 %v2294_v55  ;;  %961 = vmatpush1.bf16.msra.mxu1 %v908_v4 }
  0x2e   : > { %962 = vmatprep.subr.bf16.mxu1 %v2329_v2 }
  0x30   : > { %916 = vmatpush1.bf16.msra.mxu0 %v2292_v57 }
  0x31   : > { %917 = vmatprep.subr.bf16.mxu0 %v2297_v59  ;;  %963 = vmatpush1.bf16.msra.mxu1 %v2327_v6  ;;  %v1212_v6 = vld [vmem:[%s3118_s5 + $0x8] sm:$0xff] }
  0x32   : > { %964 = vmatprep.subr.bf16.mxu1 %v2335_v7  ;;  %v1211_v7 = vld [vmem:[%s3118_s5] sm:$0xff] }
  0x34   : > { %918 = vmatpush1.bf16.msra.mxu0 %v2295_v60 }
  0x35   : > { %919 = vmatprep.subr.bf16.mxu0 %v2300_v61  ;;  %965 = vmatpush1.bf16.msra.mxu1 %v2333_v10 }
  0x36   : > { %966 = vmatprep.subr.bf16.mxu1 %v2341_v28 }
  0x38   : > { %920 = vmatpush1.bf16.msra.mxu0 %v2298_v3 }
  0x39   : > { %921 = vmatprep.subr.bf16.mxu0 %v2303_v5  ;;  %967 = vmatpush1.bf16.msra.mxu1 %v2339_v29  ;;  %v1158_v5 = vld [vmem:[%s3117_s4 + $0x8] sm:$0xff] }
  0x3a   : > { %968 = vmatprep.subr.bf16.mxu1 %v2347_v32 }
  0x3c   : > { %922 = vmatpush1.bf16.msra.mxu0 %v2301_v8 }
  0x3d   : > { %923 = vmatprep.subr.bf16.mxu0 %v2306_v9  ;;  %969 = vmatpush1.bf16.msra.mxu1 %v2345_v33 }
  0x3e   : > { %1230 = vmatprep.subr.mxu1 %v2360_v0 }
  0x40   : > { %924 = vmatpush1.bf16.msra.mxu0 %v2304_v11 }
  0x41   : > { %925 = vmatprep.subr.bf16.mxu0 %v2309_v12 }
  0x44   : > { %926 = vmatpush1.bf16.msra.mxu0 %v2307_v13 }
  0x45   : > { %927 = vmatprep.subr.bf16.mxu0 %v2312_v14 }
  0x48   : > { %928 = vmatpush1.bf16.msra.mxu0 %v2310_v15 }
  0x49   : > { %929 = vmatprep.subr.bf16.mxu0 %v2315_v16 }
  0x4c   : > { %930 = vmatpush2.bf16.msra.mxu0 %v2313_v17 }
  0x4d   : > { %931 = vmatprep.subr.bf16.mxu0 %v2318_v18 }
  0x50   : > { %932 = vmatpush2.bf16.msra.mxu0 %v2316_v19 }
  0x51   : > { %933 = vmatprep.subr.bf16.mxu0 %v2321_v20 }
  0x54   : > { %934 = vmatpush2.bf16.msra.mxu0 %v2319_v21 }
  0x55   : > { %935 = vmatprep.subr.bf16.mxu0 %v2326_v22 }
  0x58   : > { %936 = vmatpush2.bf16.msra.mxu0 %v2324_v23 }
  0x59   : > { %937 = vmatprep.subr.bf16.mxu0 %v2332_v24 }
  0x5c   : > { %938 = vmatpush2.bf16.msra.mxu0 %v2330_v25 }
  0x5d   : > { %939 = vmatprep.subr.bf16.mxu0 %v2338_v26 }
  0x60   : > { %940 = vmatpush2.bf16.msra.mxu0 %v2336_v27 }
  0x61   : > { %941 = vmatprep.subr.bf16.mxu0 %v2344_v30 }
  0x64   : > { %942 = vmatpush2.bf16.msra.mxu0 %v2342_v31 }
  0x65   : > { %943 = vmatprep.subr.bf16.mxu0 %v2350_v34 }
  0x68   : > { %944 = vmatpush2.bf16.msra.mxu0 %v2348_v35 }
  0x69   : > { %2092 = vmatprep.subr.mxu0 %v2360_v0 }
  0x89   : > { %v457_v43 = vpop.permute.xlu0 %456 }
  0xea   : > { %v610_v44 = vpop.f32.mrf.mxu1  ;;  %v539_v45 = vpop.f32.mrf.mxu0 }
  0xeb   : > { %v2571_v46 = vadd.f32 %v610_v44, %v457_v43  ;;  %v2573_v47 = vadd.f32 %v539_v45, %v457_v43 }
  0xec   : > { %v2091_v48 = vpop.f32.mrf.mxu1  ;;  %v541_v49 = vpop.f32.mrf.mxu0 }
  0xed   : > { %v614_v50 = vmax.f32 %v2573_v47, 0.0  ;;  %v616_v51 = vmax.f32 %v2571_v46, 0.0  ;;  %v2577_v52 = vadd.f32 %v541_v49, %v457_v43 }
  0xef   : > { %v615_v56 = vmax.f32 %v2577_v52, 0.0  ;;  %620 = vrot.lane.b32.xlu1 %v614_v50, %s2363_s20 }
  0xf1   : > { %v2278_v58 = vpack.i.bf16 %v616_v51, %v615_v56 }
  0xf3   : > { %2279 = vrot.lane.b32.xlu0 %v2278_v58, %s2363_s20 }
 0x161   : > { %v621_v39 = vpop.permute.xlu1 %620 }
 0x165   : > { %v2280_v36 = vpop.permute.xlu0 %2279 }
 0x166   : > { %v2282_v37 = vunpack.i.h.bf16 %v2280_v36  ;;  %v2281_v38 = vunpack.i.l.bf16 %v2280_v36 }
 0x168   : > { %v634_v40 = vmax.f32 %v616_v51, %v2282_v37  ;;  %v628_v41 = vsel %vm626_vm4, %v2281_v38, %v2282_v37  ;;  %v627_v42 = vsel %vm626_vm4, %v621_v39, %v2281_v38 }
 0x169   : > { %v632_v43 = vmax.f32 %v614_v50, %v627_v42  ;;  %v633_v44 = vmax.f32 %v615_v56, %v628_v41 }
 0x16b   : > { %638 = vrot.lane.b32.xlu0 %v632_v43, %s2364_s24  ;;  %v2283_v45 = vpack.i.bf16 %v634_v40, %v633_v44 }
 0x16d   : > { %2284 = vrot.lane.b32.xlu1 %v2283_v45, %s2364_s24 }
 0x1dd   : > { %v639_v46 = vpop.permute.xlu0 %638 }
 0x1df   : > { %v2285_v48 = vpop.permute.xlu1 %2284 }
 0x1e0   : > { %v2287_v49 = vunpack.i.h.bf16 %v2285_v48  ;;  %v2286_v53 = vunpack.i.l.bf16 %v2285_v48 }
 0x1e2   : > { %v652_v51 = vmax.f32 %v634_v40, %v2287_v49  ;;  %v645_v54 = vsel %vm644_vm5, %v639_v46, %v2286_v53  ;;  %v646_v55 = vsel %vm644_vm5, %v2286_v53, %v2287_v49 }
 0x1e3   : > { %v650_v57 = vmax.f32 %v632_v43, %v645_v54  ;;  %v651_v47 = vmax.f32 %v633_v44, %v646_v55 }
 0x1e4   : > { %v655_v50 = vpack.c.bf16 %v652_v51, %v652_v51 }
 0x1e5   : > { %v654_v52 = vpack.c.bf16 %v651_v47, %v651_v47  ;;  %v653_v56 = vpack.c.bf16 %v650_v57, %v650_v57 }
 0x1e6   : > { %1955 = vmatmul.mubr.msk.bf16.vlgmr.msra.gmra.mxu1 %vm902_vm6, %v655_v50 }
 0x1e7   : > { %945 = vmatprep.mubr.bf16.mxu0 %v654_v52  ;;  %1956 = vmatprep.mubr.msk.f32.mxu1 %vm1223_vm8, %v1158_v5 }
 0x1e8   : > { %946 = vmatmul.mubr.bf16.vlgmr.msra.gmra.mxu0 %v653_v56 }
 0x1e9   : > { %2108 = vmatprep.mubr.msk.f32.mxu0 %vm2361_vm0, %v2360_v0 }
 0x2a6   : > { %v988_v58 = vpop.f32.mrf.mxu1 }
 0x2a8   : > { %v947_v59 = vpop.f32.mrf.mxu0  ;;  %v990_v60 = vpop.f32.mrf.mxu1 }
 0x2a9   : > { %v989_v61 = vadd.f32 %v988_v58, %v947_v59  ;;  %v2782_v59 = vld [vmem:[#allocation2 + $0x8] sm:$0xff] }
 0x2aa   : > { %v949_v62 = vpop.f32.mrf.mxu0  ;;  %v992_v63 = vpop.f32.mrf.mxu1 }
 0x2ab   : > { %1100 = vrot.lane.b32.xlu0 %v989_v61, %s2365_s25  ;;  %1104 = vrot.lane.b32.xlu1 %v989_v61, %s2366_s26  ;;  %1046 = vst.msk [vmem:[#allocation2] sm:$0x3f] %vm1045_vm7, %v989_v61  ;;  %v991_v4 = vadd.f32 %v990_v60, %v949_v62  ;;  %s2379_s25 = smov 89   ;;  %s2380_s26 = smov 90   ;;  %v1157_v63 = vld [vmem:[%s3117_s4] sm:$0xff] }
 0x2ac   : > { %v951_v1 = vpop.f32.mrf.mxu0  ;;  %v993_v2 = vpop.f32.mrf.mxu1 }
 0x2ad   : > { %v1160_v1 = vld [vmem:[%s3117_s4 + $0x18] sm:$0xff]  ;;  %v1159_v2 = vld [vmem:[%s3117_s4 + $0x10] sm:$0xff] }
 0x2ae   : > { %v952_v3 = vpop.f32.mrf.mxu0 }
 0x2af   : > { %1092 = vrot.lane.b32.xlu0 %v989_v61, %s2367_s27  ;;  %1096 = vrot.lane.b32.xlu1 %v989_v61, %s2368_s28  ;;  %s2381_s28 = smov 91  }
 0x2b2   : > { %v1161_v45 = vld [vmem:[#allocation2] sm:$0xff] }
 0x2b3   : > { %1084 = vrot.lane.b32.xlu0 %v989_v61, %s2364_s24  ;;  %1088 = vrot.lane.b32.xlu1 %v989_v61, %s2369_s29  ;;  %s2382_s29 = smov 97  }
 0x2b7   : > { %1076 = vrot.lane.b32.xlu0 %v989_v61, %s2370_s30  ;;  %1080 = vrot.lane.b32.xlu1 %v989_v61, %s2371_s13  ;;  %s2383_s30 = smov 92  }
 0x2bb   : > { %1068 = vrot.lane.b32.xlu0 %v989_v61, %s2372_s14  ;;  %1072 = vrot.lane.b32.xlu1 %v989_v61, %s2373_s15  ;;  %s2384_s15 = smov 99  }
 0x2bf   : > { %1060 = vrot.lane.b32.xlu0 %v989_v61, %s2374_s16  ;;  %1064 = vrot.lane.b32.xlu1 %v989_v61, %s2375_s17  ;;  %s2385_s16 = smov 98  }
 0x2c3   : > { %1052 = vrot.lane.b32.xlu0 %v989_v61, %s2376_s18  ;;  %1056 = vrot.lane.b32.xlu1 %v989_v61, %s2377_s19 }
 0x2c7   : > { %1149 = vrot.lane.b32.xlu0 %v989_v61, %s2378_s23  ;;  %1048 = vrot.lane.b32.xlu1 %v989_v61, %s2363_s20 }
 0x2cb   : > { %1141 = vrot.lane.b32.xlu0 %v989_v61, %s2379_s25  ;;  %1151 = vrot.lane.b32.xlu1 %v991_v4, %s2378_s23 }
 0x2cf   : > { %1133 = vrot.lane.b32.xlu0 %v989_v61, %s2380_s26  ;;  %1143 = vrot.lane.b32.xlu1 %v991_v4, %s2379_s25  ;;  %s2386_s25 = smov 100  }
 0x2d3   : > { %1128 = vrot.lane.b32.xlu0 %v989_v61, %s2381_s28  ;;  %1135 = vrot.lane.b32.xlu1 %v991_v4, %s2380_s26 }
 0x2d7   : > { %1120 = vrot.lane.b32.xlu0 %v989_v61, %s2382_s29  ;;  %1124 = vrot.lane.b32.xlu1 %v989_v61, %s2383_s30 }
 0x2db   : > { %1112 = vrot.lane.b32.xlu0 %v989_v61, %s2384_s15  ;;  %1116 = vrot.lane.b32.xlu1 %v989_v61, %s2385_s16 }
 0x2df   : > { %1220 = vperm.xlu0 %2277, %v1212_v6   ;;  %1108 = vrot.lane.b32.xlu1 %v989_v61, %s2386_s25 }
 0x2e3   : > { %1215 = vperm.xlu1 %2288, %v1211_v7  }
 0x31d   : > { %v1101_v8 = vpop.permute.xlu0 %1100  ;;  %v1105_v9 = vpop.permute.xlu1 %1104 }
 0x31e   : > { %1103 = vst.msk [vmem:[#allocation2 + $0xe0] sm:$0x3f] %vm1045_vm7, %v1101_v8  ;;  %1107 = vst.msk [vmem:[#allocation2 + $0xf0] sm:$0x3f] %vm1045_vm7, %v1105_v9 }
 0x321   : > { %v1093_v10 = vpop.permute.xlu0 %1092  ;;  %v1097_v11 = vpop.permute.xlu1 %1096 }
 0x322   : > { %1095 = vst.msk [vmem:[#allocation2 + $0xc0] sm:$0x3f] %vm1045_vm7, %v1093_v10  ;;  %1099 = vst.msk [vmem:[#allocation2 + $0xd0] sm:$0x3f] %vm1045_vm7, %v1097_v11 }
 0x325   : > { %v1085_v12 = vpop.permute.xlu0 %1084  ;;  %v1089_v13 = vpop.permute.xlu1 %1088  ;;  %v1191_v14 = vld [vmem:[#allocation2 + $0xf0] sm:$0xff]  ;;  %v1189_v15 = vld [vmem:[#allocation2 + $0xe0] sm:$0xff] }
 0x326   : > { %1087 = vst.msk [vmem:[#allocation2 + $0xa0] sm:$0x3f] %vm1045_vm7, %v1085_v12  ;;  %1091 = vst.msk [vmem:[#allocation2 + $0xb0] sm:$0x3f] %vm1045_vm7, %v1089_v13  ;;  %1231 = vmatpush1.msra.mxu1 %v1191_v14 }
 0x327   : > { %1232 = vmatprep.subr.mxu1 %v2360_v0 }
 0x328   : > { %1233 = vmatpush1.msra.mxu1 %v1189_v15 }
 0x329   : > { %v1077_v16 = vpop.permute.xlu0 %1076  ;;  %1234 = vmatprep.subr.mxu1 %v2360_v0  ;;  %v1081_v17 = vpop.permute.xlu1 %1080  ;;  %v1187_v18 = vld [vmem:[#allocation2 + $0xd0] sm:$0xff]  ;;  %v1185_v19 = vld [vmem:[#allocation2 + $0xc0] sm:$0xff] }
 0x32a   : > { %1079 = vst.msk [vmem:[#allocation2 + $0x80] sm:$0x3f] %vm1045_vm7, %v1077_v16  ;;  %1083 = vst.msk [vmem:[#allocation2 + $0x90] sm:$0x3f] %vm1045_vm7, %v1081_v17  ;;  %1235 = vmatpush1.msra.mxu1 %v1187_v18 }
 0x32b   : > { %1236 = vmatprep.subr.mxu1 %v2360_v0 }
 0x32c   : > { %1237 = vmatpush1.msra.mxu1 %v1185_v19 }
 0x32d   : > { %v1069_v20 = vpop.permute.xlu0 %1068  ;;  %1238 = vmatprep.subr.mxu1 %v2360_v0  ;;  %v1073_v21 = vpop.permute.xlu1 %1072  ;;  %v1183_v22 = vld [vmem:[#allocation2 + $0xb0] sm:$0xff]  ;;  %v1181_v23 = vld [vmem:[#allocation2 + $0xa0] sm:$0xff] }
 0x32e   : > { %1071 = vst.msk [vmem:[#allocation2 + $0x60] sm:$0x3f] %vm1045_vm7, %v1069_v20  ;;  %1075 = vst.msk [vmem:[#allocation2 + $0x70] sm:$0x3f] %vm1045_vm7, %v1073_v21  ;;  %1239 = vmatpush1.msra.mxu1 %v1183_v22 }
 0x32f   : > { %1240 = vmatprep.subr.mxu1 %v2360_v0 }
 0x330   : > { %1241 = vmatpush1.msra.mxu1 %v1181_v23 }
 0x331   : > { %v1061_v24 = vpop.permute.xlu0 %1060  ;;  %1242 = vmatprep.subr.mxu1 %v2360_v0  ;;  %v1065_v25 = vpop.permute.xlu1 %1064  ;;  %v1179_v26 = vld [vmem:[#allocation2 + $0x90] sm:$0xff]  ;;  %v1177_v27 = vld [vmem:[#allocation2 + $0x80] sm:$0xff] }
 0x332   : > { %1063 = vst.msk [vmem:[#allocation2 + $0x40] sm:$0x3f] %vm1045_vm7, %v1061_v24  ;;  %1067 = vst.msk [vmem:[#allocation2 + $0x50] sm:$0x3f] %vm1045_vm7, %v1065_v25  ;;  %1243 = vmatpush1.msra.mxu1 %v1179_v26 }
 0x333   : > { %1244 = vmatprep.subr.mxu1 %v2360_v0 }
 0x334   : > { %1245 = vmatpush1.msra.mxu1 %v1177_v27  ;;  %v1347_v27 = vld [vmem:[%s3119_s6] sm:$0xff] }
 0x335   : > { %v1053_v28 = vpop.permute.xlu0 %1052  ;;  %1246 = vmatprep.subr.mxu1 %v2360_v0  ;;  %v1057_v29 = vpop.permute.xlu1 %1056  ;;  %v1175_v30 = vld [vmem:[#allocation2 + $0x70] sm:$0xff]  ;;  %v1173_v31 = vld [vmem:[#allocation2 + $0x60] sm:$0xff] }
 0x336   : > { %1055 = vst.msk [vmem:[#allocation2 + $0x20] sm:$0x3f] %vm1045_vm7, %v1053_v28  ;;  %1059 = vst.msk [vmem:[#allocation2 + $0x30] sm:$0x3f] %vm1045_vm7, %v1057_v29  ;;  %1247 = vmatpush1.msra.mxu1 %v1175_v30  ;;  %v1348_v28 = vld [vmem:[%s3119_s6 + $0x8] sm:$0xff]  ;;  %v1349_v29 = vld [vmem:[%s3119_s6 + $0x10] sm:$0xff] }
 0x337   : > { %1248 = vmatprep.subr.mxu1 %v2360_v0  ;;  %v1350_v30 = vld [vmem:[%s3119_s6 + $0x18] sm:$0xff] }
 0x338   : > { %1249 = vmatpush1.msra.mxu1 %v1173_v31  ;;  %v1351_v31 = vld [vmem:[%s3119_s6 + $0x20] sm:$0xff] }
 0x339   : > { %v1150_v32 = vpop.permute.xlu0 %1149  ;;  %1250 = vmatprep.subr.mxu1 %v2360_v0  ;;  %v1049_v33 = vpop.permute.xlu1 %1048  ;;  %v1171_v34 = vld [vmem:[#allocation2 + $0x50] sm:$0xff]  ;;  %v1169_v35 = vld [vmem:[#allocation2 + $0x40] sm:$0xff] }
 0x33a   : > { %1051 = vst.msk [vmem:[#allocation2 + $0x10] sm:$0x3f] %vm1045_vm7, %v1049_v33  ;;  %1251 = vmatpush1.msra.mxu1 %v1171_v34  ;;  %v1353_v33 = vld [vmem:[%s3119_s6 + $0x30] sm:$0xff]  ;;  %v1354_v34 = vld [vmem:[%s3119_s6 + $0x38] sm:$0xff] }
 0x33b   : > { %1252 = vmatprep.subr.mxu1 %v2360_v0 }
 0x33c   : > { %1253 = vmatpush1.msra.mxu1 %v1169_v35  ;;  %v1355_v35 = vld [vmem:[%s3119_s6 + $0x40] sm:$0xff] }
 0x33d   : > { %v1142_v36 = vpop.permute.xlu0 %1141  ;;  %1254 = vmatprep.subr.mxu1 %v2360_v0  ;;  %v1152_v37 = vpop.permute.xlu1 %1151  ;;  %v1167_v38 = vld [vmem:[#allocation2 + $0x30] sm:$0xff]  ;;  %v1165_v40 = vld [vmem:[#allocation2 + $0x20] sm:$0xff] }
 0x33e   : > { %v1154_v39 = vsel %vm1153_vm9, %v1150_v32, %v1152_v37  ;;  %1255 = vmatpush1.msra.mxu1 %v1167_v38  ;;  %v1352_v32 = vld [vmem:[%s3119_s6 + $0x28] sm:$0xff]  ;;  %v1357_v37 = vld [vmem:[%s3119_s6 + $0x50] sm:$0xff]  ;;  %v1358_v38 = vld [vmem:[%s3119_s6 + $0x58] sm:$0xff] }
 0x33f   : > { %1156 = vst.msk [vmem:[#allocation2 + $0x180] sm:$0x3f] %vm1045_vm7, %v1154_v39  ;;  %1256 = vmatprep.subr.mxu1 %v2360_v0  ;;  %v1359_v39 = vld [vmem:[%s3119_s6 + $0x60] sm:$0xff] }
 0x340   : > { %1257 = vmatpush1.msra.mxu1 %v1165_v40  ;;  %v1360_v40 = vld [vmem:[%s3119_s6 + $0x68] sm:$0xff] }
 0x341   : > { %v1134_v41 = vpop.permute.xlu0 %1133  ;;  %1258 = vmatprep.subr.mxu1 %v2360_v0  ;;  %v1144_v42 = vpop.permute.xlu1 %1143  ;;  %v1163_v43 = vld [vmem:[#allocation2 + $0x10] sm:$0xff] }
 0x342   : > { %v1146_v44 = vsel %vm1145_vm10, %v1142_v36, %v1144_v42  ;;  %1259 = vmatpush1.msra.mxu1 %v1163_v43  ;;  %v1356_v36 = vld [vmem:[%s3119_s6 + $0x48] sm:$0xff] }
 0x343   : > { %1148 = vst.msk [vmem:[#allocation2 + $0x170] sm:$0x3f] %vm1045_vm7, %v1146_v44  ;;  %1260 = vmatprep.subr.mxu1 %v2360_v0 }
 0x344   : > { %1261 = vmatpush1.msra.mxu1 %v1161_v45 }
 0x345   : > { %v1129_v48 = vpop.permute.xlu0 %1128  ;;  %v1136_v49 = vpop.permute.xlu1 %1135  ;;  %1276 = vmatprep.subr.mxu1 %v2360_v0 }
 0x346   : > { %1131 = vst.msk [vmem:[#allocation2 + $0x150] sm:$0x3f] %vm1045_vm7, %v1129_v48  ;;  %v1138_v53 = vsel %vm1137_vm11, %v1134_v41, %v1136_v49  ;;  %v1209_v46 = vld [vmem:[#allocation2 + $0x180] sm:$0xff]  ;;  %v1361_v41 = vld [vmem:[%s3119_s6 + $0x70] sm:$0xff] }
 0x347   : > { %1140 = vst.msk [vmem:[#allocation2 + $0x160] sm:$0x3f] %vm1045_vm7, %v1138_v53  ;;  %1277 = vmatpush2.msra.mxu1 %v1209_v46 }
 0x348   : > { %1278 = vmatprep.subr.mxu1 %v2360_v0 }
 0x349   : > { %v1121_v51 = vpop.permute.xlu0 %1120  ;;  %v1125_v54 = vpop.permute.xlu1 %1124 }
 0x34a   : > { %1123 = vst.msk [vmem:[#allocation2 + $0x130] sm:$0x3f] %vm1045_vm7, %v1121_v51  ;;  %1127 = vst.msk [vmem:[#allocation2 + $0x140] sm:$0x3f] %vm1045_vm7, %v1125_v54  ;;  %v1207_v55 = vld [vmem:[#allocation2 + $0x170] sm:$0xff] }
 0x34b   : > { %1279 = vmatpush2.msra.mxu1 %v1207_v55 }
 0x34c   : > { %1280 = vmatprep.subr.mxu1 %v2360_v0 }
 0x34d   : > { %v1113_v57 = vpop.permute.xlu0 %1112  ;;  %v1117_v47 = vpop.permute.xlu1 %1116  ;;  %v1203_v52 = vld [vmem:[#allocation2 + $0x150] sm:$0xff] }
 0x34e   : > { %1115 = vst.msk [vmem:[#allocation2 + $0x110] sm:$0x3f] %vm1045_vm7, %v1113_v57  ;;  %1119 = vst.msk [vmem:[#allocation2 + $0x120] sm:$0x3f] %vm1045_vm7, %v1117_v47  ;;  %v1205_v50 = vld [vmem:[#allocation2 + $0x160] sm:$0xff] }
 0x34f   : > { %1281 = vmatpush2.msra.mxu1 %v1205_v50 }
 0x350   : > { %1282 = vmatprep.subr.mxu1 %v2360_v0 }
 0x351   : > { %1283 = vmatpush2.msra.mxu1 %v1203_v52  ;;  %v1109_v56 = vpop.permute.xlu1 %1108  ;;  %v1201_v58 = vld [vmem:[#allocation2 + $0x140] sm:$0xff]  ;;  %v1199_v60 = vld [vmem:[#allocation2 + $0x130] sm:$0xff] }
 0x352   : > { %1111 = vst.msk [vmem:[#allocation2 + $0x100] sm:$0x3f] %vm1045_vm7, %v1109_v56  ;;  %1284 = vmatprep.subr.mxu1 %v2782_v59 }
 0x353   : > { %1285 = vmatpush2.msra.mxu1 %v1201_v58 }
 0x354   : > { %1286 = vmatprep.subr.mxu1 %v2782_v59 }
 0x355   : > { %1287 = vmatpush2.msra.mxu1 %v1199_v60  ;;  %v1197_v61 = vld [vmem:[#allocation2 + $0x120] sm:$0xff]  ;;  %v1195_v0 = vld [vmem:[#allocation2 + $0x110] sm:$0xff] }
 0x356   : > { %1288 = vmatprep.subr.mxu1 %v2782_v59 }
 0x357   : > { %1289 = vmatpush2.msra.mxu1 %v1197_v61 }
 0x358   : > { %1290 = vmatprep.subr.mxu1 %v2782_v59 }
 0x359   : > { %1291 = vmatpush2.msra.mxu1 %v1195_v0  ;;  %v1193_v62 = vld [vmem:[#allocation2 + $0x100] sm:$0xff] }
 0x35a   : > { %1292 = vmatprep.subr.mxu1 %v2782_v59  ;;  %v1221_v8 = vpop.permute.xlu0 %1220 }
 0x35b   : > { %1293 = vmatpush2.msra.mxu1 %v1193_v62 }
 0x35c   : > { %1295 = vmatmul.mubr.f32.vlgmr.msra.gmra.mxu1 %v1157_v63  ;;  %2153 = vmatprep.subr.mxu1 %v2782_v59 }
 0x35d   : > { %1957 = vmatprep.mubr.msk.f32.mxu1 %vm1223_vm8, %v1160_v1 }
 0x35e   : > { %v1216_v3 = vpop.permute.xlu1 %1215 }
 0x360   : > { %1300 = vmatmul.mubr.f32.gmra.mxu1 %v1159_v2 }
 0x361   : > { %2183 = vmatprep.mubr.msk.f32.mxu1 %vm2361_vm0, %v2782_v59 }
 0x41c   : > { %v1296_v4 = vpop.f32.mrf.mxu1 }
 0x41d   : > { %v1297_v5 = vadd.f32 %v1296_v4, %v1216_v3 }
 0x41e   : > { %v1298_v6 = vpop.f32.mrf.mxu1 }
 0x41f   : > { %v1305_v7 = vmax.f32 %v1297_v5, 0.0  ;;  %v1375_v6 = vld [vmem:[%s3120_s7 + $0x68] sm:$0xff] }
 0x420   : > { %v1301_v9 = vpop.f32.mrf.mxu1 }
 0x421   : > { %v1302_v10 = vadd.f32 %v1301_v9, %v1221_v8  ;;  %1309 = vrot.lane.b32.xlu1 %v1305_v7, %s2363_s20  ;;  %v1376_v8 = vld [vmem:[%s3120_s7 + $0x70] sm:$0xff]  ;;  %v1374_v9 = vld [vmem:[%s3120_s7 + $0x60] sm:$0xff] }
 0x422   : > { %v1303_v11 = vpop.f32.mrf.mxu1 }
 0x423   : > { %v1306_v12 = vmax.f32 %v1302_v10, 0.0 }
 0x425   : > { %1311 = vrot.lane.b32.xlu0 %v1306_v12, %s2363_s20 }
 0x493   : > { %v1310_v13 = vpop.permute.xlu1 %1309 }
 0x494   : > { %v1315_v14 = vmax.f32 %v1305_v7, %v1310_v13  ;;  %v1373_v13 = vld [vmem:[%s3120_s7 + $0x58] sm:$0xff] }
 0x496   : > { %1319 = vrot.lane.b32.xlu1 %v1315_v14, %s2375_s17 }
 0x497   : > { %v1312_v15 = vpop.permute.xlu0 %1311 }
 0x498   : > { %v1316_v16 = vmax.f32 %v1306_v12, %v1312_v15 }
 0x49a   : > { %1321 = vrot.lane.b32.xlu0 %v1316_v16, %s2375_s17 }
 0x508   : > { %v1320_v17 = vpop.permute.xlu1 %1319 }
 0x509   : > { %v1325_v18 = vmax.f32 %v1315_v14, %v1320_v17  ;;  %v1372_v17 = vld [vmem:[%s3120_s7 + $0x50] sm:$0xff] }
 0x50b   : > { %1341 = vrot.lane.b32.xlu1 %v1325_v18, %s2367_s27 }
 0x50c   : > { %v1322_v19 = vpop.permute.xlu0 %1321 }
 0x50d   : > { %v1326_v20 = vmax.f32 %v1316_v16, %v1322_v19 }
 0x50f   : > { %1343 = vrot.lane.b32.xlu0 %v1326_v20, %s2367_s27  ;;  %1335 = vrot.lane.b32.xlu1 %v1325_v18, %s2364_s24  ;;  %s1906_s27 = sshll.u32 %s3128_s22, 3 }
 0x510   : > { %s3052_s19 = scalar_lea.vmem %s3125_s12, %s1906_s27 }
 0x511   : > { %1844 = vst [vmem:[%s3052_s19] sm:$0xff] %v2782_v59 }
 0x513   : > { %1337 = vrot.lane.b32.xlu0 %v1326_v20, %s2364_s24  ;;  %1329 = vrot.lane.b32.xlu1 %v1325_v18, %s2376_s18 }
 0x517   : > { %1331 = vrot.lane.b32.xlu0 %v1326_v20, %s2376_s18 }
 0x57d   : > { %v1342_v21 = vpop.permute.xlu1 %1341 }
 0x581   : > { %v1344_v22 = vpop.permute.xlu0 %1343  ;;  %v1336_v23 = vpop.permute.xlu1 %1335 }
 0x582   : > { %2093 = vmatpush3.msra.mxu0 %v1344_v22 }
 0x583   : > { %2094 = vmatprep.subr.mxu0 %v2782_v59 }
 0x584   : > { %2095 = vmatpush3.msra.mxu0 %v1342_v21 }
 0x585   : > { %v1338_v24 = vpop.permute.xlu0 %1337  ;;  %2096 = vmatprep.subr.mxu0 %v2782_v59  ;;  %v1330_v26 = vpop.permute.xlu1 %1329 }
 0x586   : > { %2097 = vmatpush3.msra.mxu0 %v1338_v24 }
 0x587   : > { %2098 = vmatprep.subr.mxu0 %v2782_v59 }
 0x588   : > { %2099 = vmatpush3.msra.mxu0 %v1336_v23  ;;  %v1370_v23 = vld [vmem:[%s3120_s7 + $0x40] sm:$0xff] }
 0x589   : > { %v1332_v25 = vpop.permute.xlu0 %1331  ;;  %2100 = vmatprep.subr.mxu0 %v2782_v59 }
 0x58a   : > { %2101 = vmatpush3.msra.mxu0 %v1332_v25 }
 0x58b   : > { %2102 = vmatprep.subr.mxu0 %v2782_v59 }
 0x58c   : > { %2103 = vmatpush3.msra.mxu0 %v1330_v26  ;;  %v1369_v26 = vld [vmem:[%s3120_s7 + $0x38] sm:$0xff] }
 0x58d   : > { %2104 = vmatprep.subr.mxu0 %v2782_v59 }
 0x58e   : > { %2105 = vmatpush3.msra.mxu0 %v1326_v20  ;;  %v1371_v20 = vld [vmem:[%s3120_s7 + $0x48] sm:$0xff] }
 0x58f   : > { %2106 = vmatprep.subr.mxu0 %v2782_v59 }
 0x590   : > { %2107 = vmatpush3.msra.mxu0 %v1325_v18 }
 0x591   : > { %2109 = vmatmul.mubr.msk.f32.vlgmr.msra.gmra.mxu0 %vm1377_vm12, %v1347_v27  ;;  %2216 = vmatprep.subr.mxu0 %v2782_v59 }
 0x592   : > { %2111 = vmatprep.mubr.msk.f32.mxu0 %vm2361_vm0, %v2782_v59 }
 0x595   : > { %2112 = vmatmul.mubr.msk.f32.gmra.mxu0 %vm1377_vm12, %v1348_v28 }
 0x596   : > { %2114 = vmatprep.mubr.msk.f32.mxu0 %vm2361_vm0, %v2782_v59 }
 0x599   : > { %2115 = vmatmul.mubr.msk.f32.gmra.mxu0 %vm1377_vm12, %v1349_v29  ;;  %v1368_v29 = vld [vmem:[%s3120_s7 + $0x30] sm:$0xff] }
 0x59a   : > { %2117 = vmatprep.mubr.msk.f32.mxu0 %vm2361_vm0, %v2782_v59 }
 0x59d   : > { %2118 = vmatmul.mubr.msk.f32.gmra.mxu0 %vm1377_vm12, %v1350_v30 }
 0x59e   : > { %2120 = vmatprep.mubr.msk.f32.mxu0 %vm2361_vm0, %v2782_v59 }
 0x5a1   : > { %2121 = vmatmul.mubr.msk.f32.gmra.mxu0 %vm1377_vm12, %v1351_v31 }
 0x5a2   : > { %2123 = vmatprep.mubr.msk.f32.mxu0 %vm2361_vm0, %v2782_v59 }
 0x5a5   : > { %2124 = vmatmul.mubr.msk.f32.gmra.mxu0 %vm1377_vm12, %v1352_v32  ;;  %v1367_v32 = vld [vmem:[%s3120_s7 + $0x28] sm:$0xff] }
 0x5a6   : > { %2126 = vmatprep.mubr.msk.f32.mxu0 %vm2361_vm0, %v2782_v59 }
 0x5a9   : > { %2127 = vmatmul.mubr.msk.f32.gmra.mxu0 %vm1377_vm12, %v1353_v33 }
 0x5aa   : > { %2129 = vmatprep.mubr.msk.f32.mxu0 %vm2361_vm0, %v2782_v59 }
 0x5ad   : > { %2130 = vmatmul.mubr.msk.f32.gmra.mxu0 %vm1377_vm12, %v1354_v34 }
 0x5ae   : > { %2132 = vmatprep.mubr.msk.f32.mxu0 %vm2361_vm0, %v2782_v59 }
 0x5b1   : > { %2133 = vmatmul.mubr.msk.f32.gmra.mxu0 %vm1377_vm12, %v1355_v35  ;;  %v1366_v35 = vld [vmem:[%s3120_s7 + $0x20] sm:$0xff] }
 0x5b2   : > { %2135 = vmatprep.mubr.msk.f32.mxu0 %vm2361_vm0, %v2782_v59 }
 0x5b5   : > { %2136 = vmatmul.mubr.msk.f32.gmra.mxu0 %vm1377_vm12, %v1356_v36 }
 0x5b6   : > { %2138 = vmatprep.mubr.msk.f32.mxu0 %vm2361_vm0, %v2782_v59 }
 0x5b9   : > { %2139 = vmatmul.mubr.msk.f32.gmra.mxu0 %vm1377_vm12, %v1357_v37 }
 0x5ba   : > { %2141 = vmatprep.mubr.msk.f32.mxu0 %vm2361_vm0, %v2782_v59 }
 0x5bd   : > { %2142 = vmatmul.mubr.msk.f32.gmra.mxu0 %vm1377_vm12, %v1358_v38  ;;  %v1365_v38 = vld [vmem:[%s3120_s7 + $0x18] sm:$0xff] }
 0x5be   : > { %2144 = vmatprep.mubr.msk.f32.mxu0 %vm2361_vm0, %v2782_v59 }
 0x5c1   : > { %2145 = vmatmul.mubr.msk.f32.gmra.mxu0 %vm1377_vm12, %v1359_v39 }
 0x5c2   : > { %2147 = vmatprep.mubr.msk.f32.mxu0 %vm2361_vm0, %v2782_v59 }
 0x5c5   : > { %2148 = vmatmul.mubr.msk.f32.gmra.mxu0 %vm1377_vm12, %v1360_v40 }
 0x5c6   : > { %2150 = vmatprep.mubr.msk.f32.mxu0 %vm2361_vm0, %v2782_v59 }
 0x5c9   : > { %2151 = vmatmul.mubr.msk.f32.gmra.mxu0 %vm1377_vm12, %v1361_v41  ;;  %v1364_v41 = vld [vmem:[%s3120_s7 + $0x10] sm:$0xff] }
 0x5ca   : > { %2238 = vmatprep.mubr.msk.f32.mxu0 %vm2361_vm0, %v2782_v59 }
 0x651   : > { %v2910_v42 = vpop.f32.mrf.mxu0 }
 0x653   : > { %v2110_v43 = vpop.f32.mrf.mxu0 }
 0x655   : > { %v2912_v44 = vpop.f32.mrf.mxu0 }
 0x657   : > { %v2113_v45 = vpop.f32.mrf.mxu0 }
 0x659   : > { %v2914_v48 = vpop.f32.mrf.mxu0 }
 0x65b   : > { %v2116_v49 = vpop.f32.mrf.mxu0 }
 0x65c   : > { %v1363_v49 = vld [vmem:[%s3120_s7 + $0x8] sm:$0xff] }
 0x65d   : > { %v2916_v53 = vpop.f32.mrf.mxu0 }
 0x65e   : > { %v1505_v43 = vadd.f32 %v2916_v53, %v1365_v38  ;;  %v1495_v53 = vadd.f32 %v2912_v44, %v1363_v49  ;;  %v1578_v44 = vld [vmem:[%s3121_s8] sm:$0xff]  ;;  %v1591_v49 = vld [vmem:[%s3122_s9 + $0x10] sm:$0xff] }
 0x65f   : > { %v2119_v46 = vpop.f32.mrf.mxu0  ;;  %v1593_v38 = vld [vmem:[%s3122_s9 + $0x20] sm:$0xff] }
 0x660   : > { %v1500_v46 = vadd.f32 %v2914_v48, %v1364_v41  ;;  %v1564_v48 = vmax.f32 %v1495_v53, 0.0  ;;  %v1592_v41 = vld [vmem:[%s3122_s9 + $0x18] sm:$0xff] }
 0x661   : > { %v2918_v51 = vpop.f32.mrf.mxu0 }
 0x662   : > { %v1510_v39 = vadd.f32 %v2918_v51, %v1366_v35  ;;  %v1594_v35 = vld [vmem:[%s3122_s9 + $0x28] sm:$0xff] }
 0x663   : > { %v2122_v54 = vpop.f32.mrf.mxu0 }
 0x664   : > { %v1567_v51 = vmax.f32 %v1510_v39, 0.0  ;;  %v1362_v54 = vld [vmem:[%s3120_s7] sm:$0xff] }
 0x665   : > { %v1514_v55 = vpop.f32.mrf.mxu0 }
 0x666   : > { %v1515_v36 = vadd.f32 %v1514_v55, %v1367_v32  ;;  %v1566_v55 = vmax.f32 %v1505_v43, 0.0  ;;  %v1595_v32 = vld [vmem:[%s3122_s9 + $0x30] sm:$0xff] }
 0x667   : > { %v2125_v57 = vpop.f32.mrf.mxu0 }
 0x668   : > { %v1568_v45 = vmax.f32 %v1515_v36, 0.0  ;;  %v1490_v57 = vadd.f32 %v2910_v42, %v1362_v54  ;;  %v1579_v42 = vld [vmem:[%s3121_s8 + $0x8] sm:$0xff] }
 0x669   : > { %v1519_v47 = vpop.f32.mrf.mxu0  ;;  %v1590_v54 = vld [vmem:[%s3122_s9 + $0x8] sm:$0xff] }
 0x66a   : > { %v1520_v33 = vadd.f32 %v1519_v47, %v1368_v29  ;;  %v1565_v47 = vmax.f32 %v1500_v46, 0.0 }
 0x66b   : > { %v2128_v50 = vpop.f32.mrf.mxu0 }
 0x66c   : > { %v1569_v40 = vmax.f32 %v1520_v33, 0.0  ;;  %v1563_v50 = vmax.f32 %v1490_v57, 0.0  ;;  %v1589_v57 = vld [vmem:[%s3122_s9] sm:$0xff] }
 0x66d   : > { %v1524_v52 = vpop.f32.mrf.mxu0 }
 0x66e   : > { %v1525_v30 = vadd.f32 %v1524_v52, %v1369_v26  ;;  %v1580_v52 = vld [vmem:[%s3121_s8 + $0x10] sm:$0xff] }
 0x66f   : > { %v2131_v56 = vpop.f32.mrf.mxu0 }
 0x670   : > { %v1570_v37 = vmax.f32 %v1525_v30, 0.0  ;;  %v1581_v56 = vld [vmem:[%s3121_s8 + $0x18] sm:$0xff] }
 0x671   : > { %v1529_v58 = vpop.f32.mrf.mxu0 }
 0x672   : > { %v1530_v27 = vadd.f32 %v1529_v58, %v1370_v23  ;;  %v1582_v58 = vld [vmem:[%s3121_s8 + $0x20] sm:$0xff]  ;;  %v1599_v23 = vld [vmem:[%s3122_s9 + $0x50] sm:$0xf] }
 0x673   : > { %v2134_v60 = vpop.f32.mrf.mxu0 }
 0x674   : > { %v1571_v34 = vmax.f32 %v1530_v27, 0.0  ;;  %v1583_v60 = vld [vmem:[%s3121_s8 + $0x28] sm:$0xff] }
 0x675   : > { %v1534_v61 = vpop.f32.mrf.mxu0 }
 0x676   : > { %v1535_v24 = vadd.f32 %v1534_v61, %v1371_v20  ;;  %v1584_v61 = vld [vmem:[%s3121_s8 + $0x30] sm:$0xff] }
 0x677   : > { %v2137_v0 = vpop.f32.mrf.mxu0 }
 0x678   : > { %v1572_v31 = vmax.f32 %v1535_v24, 0.0  ;;  %v1585_v0 = vld [vmem:[%s3121_s8 + $0x38] sm:$0xff]  ;;  %v1597_v24 = vld [vmem:[%s3122_s9 + $0x40] sm:$0xff] }
 0x679   : > { %v1539_v62 = vpop.f32.mrf.mxu0 }
 0x67a   : > { %v1540_v21 = vadd.f32 %v1539_v62, %v1372_v17  ;;  %v1586_v62 = vld [vmem:[%s3121_s8 + $0x40] sm:$0xff] }
 0x67b   : > { %v2140_v63 = vpop.f32.mrf.mxu0 }
 0x67c   : > { %v1573_v28 = vmax.f32 %v1540_v21, 0.0  ;;  %v1587_v63 = vld [vmem:[%s3121_s8 + $0x48] sm:$0xff] }
 0x67d   : > { %v1544_v1 = vpop.f32.mrf.mxu0  ;;  %v1598_v21 = vld [vmem:[%s3122_s9 + $0x48] sm:$0xff] }
 0x67e   : > { %v1545_v18 = vadd.f32 %v1544_v1, %v1373_v13  ;;  %v1588_v1 = vld [vmem:[%s3121_s8 + $0x50] sm:$0xf] }
 0x67f   : > { %v2143_v2 = vpop.f32.mrf.mxu0 }
 0x680   : > { %v1574_v25 = vmax.f32 %v1545_v18, 0.0 }
 0x681   : > { %v1549_v3 = vpop.f32.mrf.mxu0 }
 0x682   : > { %v1550_v15 = vadd.f32 %v1549_v3, %v1374_v9 }
 0x683   : > { %v2146_v4 = vpop.f32.mrf.mxu0 }
 0x684   : > { %v1575_v22 = vmax.f32 %v1550_v15, 0.0 }
 0x685   : > { %v1554_v5 = vpop.f32.mrf.mxu0 }
 0x686   : > { %v1555_v11 = vadd.f32 %v1554_v5, %v1375_v6 }
 0x687   : > { %v2149_v7 = vpop.f32.mrf.mxu0 }
 0x688   : > { %v1576_v19 = vmax.f32 %v1555_v11, 0.0 }
 0x689   : > { %v1559_v10 = vpop.f32.mrf.mxu0 }
 0x68a   : > { %v1560_v12 = vadd.f32 %v1559_v10, %v1376_v8 }
 0x68b   : > { %v2152_v14 = vpop.f32.mrf.mxu0 }
 0x68c   : > { %v1577_v16 = vmax.f32 %v1560_v12, 0.0 }
 0x68e   : > { %2154 = vmatpush3.msra.mxu1 %v1577_v16 }
 0x68f   : > { %2155 = vmatprep.subr.mxu1 %v2782_v59 }
 0x690   : > { %2156 = vmatpush3.msra.mxu1 %v1576_v19 }
 0x691   : > { %2157 = vmatprep.subr.mxu1 %v2782_v59 }
 0x692   : > { %2158 = vmatpush3.msra.mxu1 %v1575_v22 }
 0x693   : > { %2159 = vmatprep.subr.mxu1 %v2782_v59 }
 0x694   : > { %2160 = vmatpush3.msra.mxu1 %v1574_v25 }
 0x695   : > { %2161 = vmatprep.subr.mxu1 %v2782_v59 }
 0x696   : > { %2162 = vmatpush3.msra.mxu1 %v1573_v28  ;;  %v1596_v28 = vld [vmem:[%s3122_s9 + $0x38] sm:$0xff] }
 0x697   : > { %2163 = vmatprep.subr.mxu1 %v2782_v59 }
 0x698   : > { %2164 = vmatpush3.msra.mxu1 %v1572_v31 }
 0x699   : > { %2165 = vmatprep.subr.mxu1 %v2782_v59 }
 0x69a   : > { %2166 = vmatpush3.msra.mxu1 %v1571_v34 }
 0x69b   : > { %2167 = vmatprep.subr.mxu1 %v2782_v59 }
 0x69c   : > { %2168 = vmatpush3.msra.mxu1 %v1570_v37 }
 0x69d   : > { %2169 = vmatprep.subr.mxu1 %v2782_v59 }
 0x69e   : > { %2170 = vmatpush3.msra.mxu1 %v1569_v40 }
 0x69f   : > { %2171 = vmatprep.subr.mxu1 %v2782_v59 }
 0x6a0   : > { %2172 = vmatpush3.msra.mxu1 %v1568_v45 }
 0x6a1   : > { %2173 = vmatprep.subr.mxu1 %v2782_v59 }
 0x6a2   : > { %2174 = vmatpush3.msra.mxu1 %v1567_v51 }
 0x6a3   : > { %2175 = vmatprep.subr.mxu1 %v2782_v59 }
 0x6a4   : > { %2176 = vmatpush3.msra.mxu1 %v1566_v55 }
 0x6a5   : > { %2177 = vmatprep.subr.mxu1 %v2782_v59 }
 0x6a6   : > { %2178 = vmatpush3.msra.mxu1 %v1565_v47 }
 0x6a7   : > { %2179 = vmatprep.subr.mxu1 %v2782_v59 }
 0x6a8   : > { %2180 = vmatpush3.msra.mxu1 %v1564_v48 }
 0x6a9   : > { %2181 = vmatprep.subr.mxu1 %v2782_v59 }
 0x6aa   : > { %2182 = vmatpush3.msra.mxu1 %v1563_v50 }
 0x6ab   : > { %2184 = vmatmul.mubr.msk.f32.vlgmr.msra.gmra.mxu1 %vm1600_vm13, %v1578_v44 }
 0x6ac   : > { %2186 = vmatprep.mubr.msk.f32.mxu1 %vm2361_vm0, %v2782_v59 }
 0x6af   : > { %2187 = vmatmul.mubr.msk.f32.gmra.mxu1 %vm1600_vm13, %v1579_v42 }
 0x6b0   : > { %2189 = vmatprep.mubr.msk.f32.mxu1 %vm2361_vm0, %v2782_v59 }
 0x6b3   : > { %2190 = vmatmul.mubr.msk.f32.gmra.mxu1 %vm1600_vm13, %v1580_v52 }
 0x6b4   : > { %2192 = vmatprep.mubr.msk.f32.mxu1 %vm2361_vm0, %v2782_v59 }
 0x6b7   : > { %2193 = vmatmul.mubr.msk.f32.gmra.mxu1 %vm1600_vm13, %v1581_v56  ;;  %v1765_v56 = vld [vmem:[%s3123_s10] sm:$0x3f] }
 0x6b8   : > { %2195 = vmatprep.mubr.msk.f32.mxu1 %vm2361_vm0, %v2782_v59 }
 0x6bb   : > { %2196 = vmatmul.mubr.msk.f32.gmra.mxu1 %vm1600_vm13, %v1582_v58  ;;  %v1766_v58 = vld [vmem:[%s3124_s11] sm:$0x3f] }
 0x6bc   : > { %2198 = vmatprep.mubr.msk.f32.mxu1 %vm2361_vm0, %v2782_v59 }
 0x6bf   : > { %2199 = vmatmul.mubr.msk.f32.gmra.mxu1 %vm1600_vm13, %v1583_v60 }
 0x6c0   : > { %2201 = vmatprep.mubr.msk.f32.mxu1 %vm2361_vm0, %v2782_v59 }
 0x6c3   : > { %2202 = vmatmul.mubr.msk.f32.gmra.mxu1 %vm1600_vm13, %v1584_v61 }
 0x6c4   : > { %2204 = vmatprep.mubr.msk.f32.mxu1 %vm2361_vm0, %v2782_v59 }
 0x6c7   : > { %2205 = vmatmul.mubr.msk.f32.gmra.mxu1 %vm1600_vm13, %v1585_v0 }
 0x6c8   : > { %2207 = vmatprep.mubr.msk.f32.mxu1 %vm2361_vm0, %v2782_v59 }
 0x6cb   : > { %2208 = vmatmul.mubr.msk.f32.gmra.mxu1 %vm1600_vm13, %v1586_v62 }
 0x6cc   : > { %2210 = vmatprep.mubr.msk.f32.mxu1 %vm2361_vm0, %v2782_v59 }
 0x6cf   : > { %2211 = vmatmul.mubr.msk.f32.gmra.mxu1 %vm1600_vm13, %v1587_v63 }
 0x6d0   : > { %2213 = vmatprep.mubr.msk.f32.mxu1 %vm2361_vm0, %v2782_v59 }
 0x6d3   : > { %2214 = vmatmul.mubr.msk.f32.gmra.mxu1 %vm1600_vm13, %v1588_v1 }
 0x76b   : > { %v3056_v2 = vpop.f32.mrf.mxu1 }
 0x76c   : > { %v1701_v50 = vadd.f32 %v3056_v2, %v1589_v57 }
 0x76d   : > { %v2185_v3 = vpop.f32.mrf.mxu1 }
 0x76e   : > { %v1754_v52 = vmax.f32 %v1701_v50, 0.0 }
 0x76f   : > { %v1705_v4 = vpop.f32.mrf.mxu1 }
 0x770   : > { %v1706_v47 = vadd.f32 %v1705_v4, %v1590_v54 }
 0x771   : > { %v2188_v5 = vpop.f32.mrf.mxu1 }
 0x772   : > { %v1755_v42 = vmax.f32 %v1706_v47, 0.0 }
 0x773   : > { %v1710_v6 = vpop.f32.mrf.mxu1 }
 0x774   : > { %v1711_v53 = vadd.f32 %v1710_v6, %v1591_v49 }
 0x775   : > { %v2191_v7 = vpop.f32.mrf.mxu1 }
 0x776   : > { %v1756_v44 = vmax.f32 %v1711_v53, 0.0 }
 0x777   : > { %v1715_v8 = vpop.f32.mrf.mxu1 }
 0x778   : > { %v1716_v46 = vadd.f32 %v1715_v8, %v1592_v41 }
 0x779   : > { %v2194_v9 = vpop.f32.mrf.mxu1 }
 0x77a   : > { %v1757_v48 = vmax.f32 %v1716_v46, 0.0 }
 0x77b   : > { %v1720_v10 = vpop.f32.mrf.mxu1 }
 0x77c   : > { %v1721_v43 = vadd.f32 %v1720_v10, %v1593_v38 }
 0x77d   : > { %v2197_v11 = vpop.f32.mrf.mxu1 }
 0x77e   : > { %v1758_v55 = vmax.f32 %v1721_v43, 0.0 }
 0x77f   : > { %v1725_v12 = vpop.f32.mrf.mxu1 }
 0x780   : > { %v1726_v39 = vadd.f32 %v1725_v12, %v1594_v35 }
 0x781   : > { %v2200_v13 = vpop.f32.mrf.mxu1 }
 0x782   : > { %v1759_v51 = vmax.f32 %v1726_v39, 0.0 }
 0x783   : > { %v1730_v14 = vpop.f32.mrf.mxu1 }
 0x784   : > { %v1731_v36 = vadd.f32 %v1730_v14, %v1595_v32 }
 0x785   : > { %v2203_v15 = vpop.f32.mrf.mxu1 }
 0x786   : > { %v1760_v45 = vmax.f32 %v1731_v36, 0.0 }
 0x787   : > { %v1735_v16 = vpop.f32.mrf.mxu1 }
 0x788   : > { %v1736_v33 = vadd.f32 %v1735_v16, %v1596_v28 }
 0x789   : > { %v2206_v17 = vpop.f32.mrf.mxu1 }
 0x78a   : > { %v1761_v40 = vmax.f32 %v1736_v33, 0.0 }
 0x78b   : > { %v1740_v18 = vpop.f32.mrf.mxu1 }
 0x78c   : > { %v1741_v30 = vadd.f32 %v1740_v18, %v1597_v24 }
 0x78d   : > { %v2209_v19 = vpop.f32.mrf.mxu1 }
 0x78e   : > { %v1762_v37 = vmax.f32 %v1741_v30, 0.0 }
 0x78f   : > { %v1745_v20 = vpop.f32.mrf.mxu1 }
 0x790   : > { %v1746_v26 = vadd.f32 %v1745_v20, %v1598_v21 }
 0x791   : > { %v2212_v22 = vpop.f32.mrf.mxu1 }
 0x792   : > { %v1763_v34 = vmax.f32 %v1746_v26, 0.0 }
 0x793   : > { %v1750_v25 = vpop.f32.mrf.mxu1 }
 0x794   : > { %v1751_v27 = vadd.f32 %v1750_v25, %v1599_v23 }
 0x795   : > { %v2215_v29 = vpop.f32.mrf.mxu1 }
 0x796   : > { %v1764_v31 = vmax.f32 %v1751_v27, 0.0 }
 0x798   : > { %2217 = vmatpush3.msk.msra.mxu0 %vm463_vm1, %v1764_v31 }
 0x799   : > { %2218 = vmatprep.subr.mxu0 %v2782_v59 }
 0x79a   : > { %2219 = vmatpush3.msra.mxu0 %v1763_v34 }
 0x79b   : > { %2220 = vmatprep.subr.mxu0 %v2782_v59 }
 0x79c   : > { %2221 = vmatpush3.msra.mxu0 %v1762_v37 }
 0x79d   : > { %2222 = vmatprep.subr.mxu0 %v2782_v59 }
 0x79e   : > { %2223 = vmatpush3.msra.mxu0 %v1761_v40 }
 0x79f   : > { %2224 = vmatprep.subr.mxu0 %v2782_v59 }
 0x7a0   : > { %2225 = vmatpush3.msra.mxu0 %v1760_v45 }
 0x7a1   : > { %2226 = vmatprep.subr.mxu0 %v2782_v59 }
 0x7a2   : > { %2227 = vmatpush3.msra.mxu0 %v1759_v51 }
 0x7a3   : > { %2228 = vmatprep.subr.mxu0 %v2782_v59 }
 0x7a4   : > { %2229 = vmatpush3.msra.mxu0 %v1758_v55 }
 0x7a5   : > { %2230 = vmatprep.subr.mxu0 %v2782_v59 }
 0x7a6   : > { %2231 = vmatpush3.msra.mxu0 %v1757_v48 }
 0x7a7   : > { %2232 = vmatprep.subr.mxu0 %v2782_v59 }
 0x7a8   : > { %2233 = vmatpush3.msra.mxu0 %v1756_v44 }
 0x7a9   : > { %2234 = vmatprep.subr.mxu0 %v2782_v59 }
 0x7aa   : > { %2235 = vmatpush3.msra.mxu0 %v1755_v42 }
 0x7ab   : > { %2236 = vmatprep.subr.mxu0 %v2782_v59 }
 0x7ac   : > { %2237 = vmatpush3.msra.mxu0 %v1754_v52 }
 0x7ad   : > { %2239 = vmatmul.mubr.msk.f32.vlgmr.msra.gmra.mxu0 %vm1767_vm14, %v1765_v56 }
 0x86d   : > { %v1840_v60 = vpop.f32.mrf.mxu0 }
 0x86e   : > { %v1841_v61 = vadd.f32 %v1840_v60, %v1766_v58 }
 0x86f   : > { %v2240_v0 = vpop.f32.mrf.mxu0 }
 0x870   : > { %1846 = vst.msk [vmem:[%s3052_s19] sm:$0x3f] %vm1845_vm15, %v1841_v61 }
 0x871 PF: > { %s22_s21 = sadd.s32 1, %s2358_s21  }
 0x872   : > { %p19_p4 = scmp.ge.s32.totalorder %s22_s21, 4  }
 0x874   :  { %21 = sbr.rel (!%p19_p4) target bundleno = 1 (0x1), region = 98 }

</bundles_post_ra>
